<compile_context>
chip_gen: v7x
topology: tpu7x:2x2x1
jax: 0.10.0
libtpu: 0.0.40
codegen_flags: <defaults>
</compile_context>

<pallas_src>
import functools

import jax
import jax.numpy as jnp
from jax.experimental import pallas as pl
from jax.experimental.pallas import tpu as pltpu

K = 4
INPUT_SIZE = 3 * K        # 12
OUTPUT_SIZE = K           # 4
HIDDEN = (32, 64, 128, 64, 32)
BN_EPS = 1e-5

INPUT_PAD = 16            # 12 -> 16  (sublane multiple)
OUT_PAD = 8               # 4  -> 8   (sublane multiple)
MAXF = 128                # widest feature dim
NUM_LAYERS = 6

LAYER_IN = (INPUT_PAD, 32, 64, 128, 64, 32)
LAYER_OUT = (32, 64, 128, 64, 32, OUT_PAD)


def congestion_ae_kernel(x_ref, w_ref, v_ref, o_ref, *, n_valid):
    """Feature-major forward pass.

    x_ref: [INPUT_PAD, Bp]   (batch on lanes, zero-padded)
    w_ref: [6, 128, 128]     layer l weight at [l, :out_l, :in_l] (PyTorch [out,in])
    v_ref: [128, 18]         column 3l = bias_l, 3l+1 = gamma_l, 3l+2 = beta_l
    o_ref: [OUT_PAD, Bp]
    n_valid: true (unpadded) batch size, baked in statically.
    """
    b_pad = x_ref.shape[-1]
    inv_n = jnp.float32(1.0 / n_valid)
    col = jax.lax.broadcasted_iota(jnp.int32, (1, b_pad), 1)
    mask = (col < n_valid).astype(jnp.float32)            # [1, Bp]

    def linear(h, l):
        out_d, in_d = LAYER_OUT[l], LAYER_IN[l]
        w = w_ref[l, :out_d, :in_d]                       # [out, in]
        b = v_ref[:out_d, 3 * l:3 * l + 1]                # [out, 1]
        return jnp.dot(w, h, preferred_element_type=jnp.float32) + b

    def bn_relu(h, l):
        out_d = LAYER_OUT[l]
        gamma = v_ref[:out_d, 3 * l + 1:3 * l + 2]        # [out, 1]
        beta = v_ref[:out_d, 3 * l + 2:3 * l + 3]         # [out, 1]
        # One-pass masked statistics over the valid batch columns (lane reduce).
        hm = h * mask
        s1 = jnp.sum(hm, axis=-1, keepdims=True)
        s2 = jnp.sum(hm * hm, axis=-1, keepdims=True)
        mean = s1 * inv_n
        var = jnp.maximum(s2 * inv_n - mean * mean, 0.0)
        scale = gamma * jax.lax.rsqrt(var + BN_EPS)       # BN affine folded in
        return jnp.maximum((h - mean) * scale + beta, 0.0)

    x = x_ref[...]
    h1 = bn_relu(linear(x, 0), 0)          # [32,  B]
    h2 = bn_relu(linear(h1, 1), 1)         # [64,  B]
    h3 = bn_relu(linear(h2, 2), 2)         # [128, B]
    h4 = bn_relu(linear(h3, 3), 3) + h2    # [64,  B]
    h5 = bn_relu(linear(h4, 4), 4) + h1    # [32,  B]
    o_ref[...] = linear(h5, 5).astype(o_ref.dtype)        # [8, B], lane-dense store


def init_params(key):
    """Deterministic init matching PyTorch init_weights():
       Linear weight: kaiming_normal_(fan_in, relu) -> std = sqrt(2/fan_in)
       Linear bias: 0; BatchNorm gamma = 1, beta = 0.
       Parameters are packed into two slabs for a compact kernel interface."""
    dims = (INPUT_SIZE,) + HIDDEN + (OUTPUT_SIZE,)        # (12,32,64,128,64,32,4)
    keys = jax.random.split(key, NUM_LAYERS)
    w_slab = jnp.zeros((NUM_LAYERS, MAXF, MAXF), jnp.float32)
    v_slab = jnp.zeros((MAXF, 3 * NUM_LAYERS), jnp.float32)
    for l in range(NUM_LAYERS):
        fan_in, fan_out = dims[l], dims[l + 1]
        std = (2.0 / fan_in) ** 0.5
        w = std * jax.random.normal(keys[l], (fan_out, fan_in), jnp.float32)
        w_slab = w_slab.at[l, :fan_out, :fan_in].set(w)   # PyTorch [out, in]
        # bias column 3l stays 0
        if l < NUM_LAYERS - 1:                            # bn1..bn5 only
            v_slab = v_slab.at[:fan_out, 3 * l + 1].set(1.0)   # gamma
            # beta column 3l+2 stays 0
    return w_slab, v_slab


@jax.jit
def congestion_autoencoder(x, w_slab, v_slab):
    B = x.shape[0]
    B_pad = ((B + 127) // 128) * 128                      # batch on lanes, 128-aligned
    xt = jnp.pad(jnp.transpose(x),
                 ((0, INPUT_PAD - INPUT_SIZE), (0, B_pad - B)))   # [16, Bp]
    vmem_spec = pl.BlockSpec(memory_space=pltpu.MemorySpace.VMEM)
    out = pl.pallas_call(
        functools.partial(congestion_ae_kernel, n_valid=B),
        out_shape=jax.ShapeDtypeStruct((OUT_PAD, B_pad), jnp.float32),
        in_specs=[vmem_spec, vmem_spec, vmem_spec],
        out_specs=vmem_spec,
        compiler_params=pltpu.CompilerParams(
            vmem_limit_bytes=48 * 1024 * 1024),
    )(xt, w_slab, v_slab)
    return jnp.transpose(out[:OUTPUT_SIZE, :B])           # back to [B, 4]


def reference_forward(x, w_slab, v_slab):
    """Pure-JAX reference with the original [B, F] semantics."""
    dims = (INPUT_SIZE,) + HIDDEN + (OUTPUT_SIZE,)
    hi = jax.lax.Precision.HIGHEST

    def lin(h, l):
        w = w_slab[l, :dims[l + 1], :dims[l]]
        b = v_slab[:dims[l + 1], 3 * l]
        return jnp.dot(h, w.T, precision=hi) + b

    def bn_relu(h, l):
        g = v_slab[:dims[l + 1], 3 * l + 1]
        be = v_slab[:dims[l + 1], 3 * l + 2]
        m = jnp.mean(h, axis=0, keepdims=True)
        v = jnp.mean((h - m) ** 2, axis=0, keepdims=True)
        return jnp.maximum((h - m) / jnp.sqrt(v + BN_EPS) * g + be, 0.0)

    x1 = bn_relu(lin(x, 0), 0)
    x2 = bn_relu(lin(x1, 1), 1)
    x3 = bn_relu(lin(x2, 2), 2)
    x4 = bn_relu(lin(x3, 3), 3) + x2
    x5 = bn_relu(lin(x4, 4), 4) + x1
    return lin(x5, 5)


if __name__ == "__main__":
    key = jax.random.PRNGKey(0)
    k_x, k_p = jax.random.split(key)

    B = 8
    x = jax.random.normal(k_x, (B, INPUT_SIZE), jnp.float32)
    w_slab, v_slab = init_params(k_p)

    out = congestion_autoencoder(x, w_slab, v_slab)
    out = jax.block_until_ready(out)

    ref = reference_forward(x, w_slab, v_slab)
    assert out.shape == (B, OUTPUT_SIZE)
    max_err = jnp.max(jnp.abs(out - ref))
    assert jnp.allclose(out, ref, atol=2e-3, rtol=2e-3), (
        f"max abs err = {max_err}")

    print("KERNEL_OK")
</pallas_src>

<mosaic_0001>
module attributes {stable_mosaic.version = 11 : i64} {
  func.func @congestion_ae_kernel(%arg0: memref<16x128xf32, #tpu.memory_space<vmem>>, %arg1: memref<6x128x128xf32, #tpu.memory_space<vmem>>, %arg2: memref<128x18xf32, #tpu.memory_space<vmem>>, %arg3: memref<8x128xf32, #tpu.memory_space<vmem>>) attributes {dimension_semantics = [], scalar_prefetch = 0 : i64, scratch_operands = 0 : i64, tpu.core_type = #tpu.core_type<tc>} {
    %0 = tpu.iota {dimensions = array<i32: 1>} : vector<1x128xi32>
    %c8_i32 = arith.constant 8 : i32
    %1 = vector.broadcast %c8_i32 : i32 to vector<1x128xi32>
    %2 = arith.cmpi slt, %0, %1 : vector<1x128xi32>
    %3 = arith.extui %2 : vector<1x128xi1> to vector<1x128xi32>
    %4 = arith.sitofp %3 : vector<1x128xi32> to vector<1x128xf32>
    %c0 = arith.constant 0 : index
    %c0_0 = arith.constant 0 : index
    %5 = vector.load %arg0[%c0, %c0_0] : memref<16x128xf32, #tpu.memory_space<vmem>>, vector<16x128xf32>
    %c0_1 = arith.constant 0 : index
    %c0_2 = arith.constant 0 : index
    %c0_3 = arith.constant 0 : index
    %6 = vector.load %arg1[%c0_1, %c0_2, %c0_3] : memref<6x128x128xf32, #tpu.memory_space<vmem>>, vector<1x32x16xf32>
    %7 = vector.shape_cast %6 : vector<1x32x16xf32> to vector<32x16xf32>
    %c0_4 = arith.constant 0 : index
    %c0_5 = arith.constant 0 : index
    %8 = vector.load %arg2[%c0_4, %c0_5] : memref<128x18xf32, #tpu.memory_space<vmem>>, vector<32x1xf32>
    %cst = arith.constant dense<0.000000e+00> : vector<32x128xf32>
    %9 = tpu.matmul %7, %5, %cst {dimension_numbers = #tpu.dot_dimension_numbers<[1], [0], [0], [1], [0, 0, 1, 1], [], []>} : vector<32x16xf32>, vector<16x128xf32>, vector<32x128xf32> -> vector<32x128xf32>
    %10 = vector.broadcast %8 : vector<32x1xf32> to vector<32x128xf32>
    %11 = arith.addf %9, %10 : vector<32x128xf32>
    %c0_6 = arith.constant 0 : index
    %c1 = arith.constant 1 : index
    %12 = vector.load %arg2[%c0_6, %c1] : memref<128x18xf32, #tpu.memory_space<vmem>>, vector<32x1xf32>
    %c0_7 = arith.constant 0 : index
    %c2 = arith.constant 2 : index
    %13 = vector.load %arg2[%c0_7, %c2] : memref<128x18xf32, #tpu.memory_space<vmem>>, vector<32x1xf32>
    %14 = vector.broadcast %4 : vector<1x128xf32> to vector<32x128xf32>
    %15 = arith.mulf %11, %14 : vector<32x128xf32>
    %cst_8 = arith.constant dense<0.000000e+00> : vector<32xf32>
    %16 = vector.multi_reduction <add>, %15, %cst_8 [1] : vector<32x128xf32> to vector<32xf32>
    %17 = vector.shape_cast %16 : vector<32xf32> to vector<32x1xf32>
    %18 = arith.mulf %15, %15 : vector<32x128xf32>
    %cst_9 = arith.constant dense<0.000000e+00> : vector<32xf32>
    %19 = vector.multi_reduction <add>, %18, %cst_9 [1] : vector<32x128xf32> to vector<32xf32>
    %20 = vector.shape_cast %19 : vector<32xf32> to vector<32x1xf32>
    %cst_10 = arith.constant 1.250000e-01 : f32
    %21 = vector.broadcast %cst_10 : f32 to vector<32x1xf32>
    %22 = arith.mulf %17, %21 : vector<32x1xf32>
    %cst_11 = arith.constant 1.250000e-01 : f32
    %23 = vector.broadcast %cst_11 : f32 to vector<32x1xf32>
    %24 = arith.mulf %20, %23 : vector<32x1xf32>
    %25 = arith.mulf %22, %22 : vector<32x1xf32>
    %26 = arith.subf %24, %25 : vector<32x1xf32>
    %cst_12 = arith.constant 0.000000e+00 : f32
    %27 = vector.broadcast %cst_12 : f32 to vector<32x1xf32>
    %28 = arith.maximumf %26, %27 : vector<32x1xf32>
    %cst_13 = arith.constant 9.99999974E-6 : f32
    %29 = vector.broadcast %cst_13 : f32 to vector<32x1xf32>
    %30 = arith.addf %28, %29 : vector<32x1xf32>
    %31 = math.rsqrt %30 : vector<32x1xf32>
    %32 = arith.mulf %12, %31 : vector<32x1xf32>
    %33 = vector.broadcast %22 : vector<32x1xf32> to vector<32x128xf32>
    %34 = arith.subf %11, %33 : vector<32x128xf32>
    %35 = vector.broadcast %32 : vector<32x1xf32> to vector<32x128xf32>
    %36 = arith.mulf %34, %35 : vector<32x128xf32>
    %37 = vector.broadcast %13 : vector<32x1xf32> to vector<32x128xf32>
    %38 = arith.addf %36, %37 : vector<32x128xf32>
    %cst_14 = arith.constant 0.000000e+00 : f32
    %39 = vector.broadcast %cst_14 : f32 to vector<32x128xf32>
    %40 = arith.maximumf %38, %39 : vector<32x128xf32>
    %c1_15 = arith.constant 1 : index
    %c0_16 = arith.constant 0 : index
    %c0_17 = arith.constant 0 : index
    %41 = vector.load %arg1[%c1_15, %c0_16, %c0_17] : memref<6x128x128xf32, #tpu.memory_space<vmem>>, vector<1x64x32xf32>
    %42 = vector.shape_cast %41 : vector<1x64x32xf32> to vector<64x32xf32>
    %c0_18 = arith.constant 0 : index
    %c3 = arith.constant 3 : index
    %43 = vector.load %arg2[%c0_18, %c3] : memref<128x18xf32, #tpu.memory_space<vmem>>, vector<64x1xf32>
    %cst_19 = arith.constant dense<0.000000e+00> : vector<64x128xf32>
    %44 = tpu.matmul %42, %40, %cst_19 {dimension_numbers = #tpu.dot_dimension_numbers<[1], [0], [0], [1], [0, 0, 1, 1], [], []>} : vector<64x32xf32>, vector<32x128xf32>, vector<64x128xf32> -> vector<64x128xf32>
    %45 = vector.broadcast %43 : vector<64x1xf32> to vector<64x128xf32>
    %46 = arith.addf %44, %45 : vector<64x128xf32>
    %c0_20 = arith.constant 0 : index
    %c4 = arith.constant 4 : index
    %47 = vector.load %arg2[%c0_20, %c4] : memref<128x18xf32, #tpu.memory_space<vmem>>, vector<64x1xf32>
    %c0_21 = arith.constant 0 : index
    %c5 = arith.constant 5 : index
    %48 = vector.load %arg2[%c0_21, %c5] : memref<128x18xf32, #tpu.memory_space<vmem>>, vector<64x1xf32>
    %49 = vector.broadcast %4 : vector<1x128xf32> to vector<64x128xf32>
    %50 = arith.mulf %46, %49 : vector<64x128xf32>
    %cst_22 = arith.constant dense<0.000000e+00> : vector<64xf32>
    %51 = vector.multi_reduction <add>, %50, %cst_22 [1] : vector<64x128xf32> to vector<64xf32>
    %52 = vector.shape_cast %51 : vector<64xf32> to vector<64x1xf32>
    %53 = arith.mulf %50, %50 : vector<64x128xf32>
    %cst_23 = arith.constant dense<0.000000e+00> : vector<64xf32>
    %54 = vector.multi_reduction <add>, %53, %cst_23 [1] : vector<64x128xf32> to vector<64xf32>
    %55 = vector.shape_cast %54 : vector<64xf32> to vector<64x1xf32>
    %cst_24 = arith.constant 1.250000e-01 : f32
    %56 = vector.broadcast %cst_24 : f32 to vector<64x1xf32>
    %57 = arith.mulf %52, %56 : vector<64x1xf32>
    %cst_25 = arith.constant 1.250000e-01 : f32
    %58 = vector.broadcast %cst_25 : f32 to vector<64x1xf32>
    %59 = arith.mulf %55, %58 : vector<64x1xf32>
    %60 = arith.mulf %57, %57 : vector<64x1xf32>
    %61 = arith.subf %59, %60 : vector<64x1xf32>
    %cst_26 = arith.constant 0.000000e+00 : f32
    %62 = vector.broadcast %cst_26 : f32 to vector<64x1xf32>
    %63 = arith.maximumf %61, %62 : vector<64x1xf32>
    %cst_27 = arith.constant 9.99999974E-6 : f32
    %64 = vector.broadcast %cst_27 : f32 to vector<64x1xf32>
    %65 = arith.addf %63, %64 : vector<64x1xf32>
    %66 = math.rsqrt %65 : vector<64x1xf32>
    %67 = arith.mulf %47, %66 : vector<64x1xf32>
    %68 = vector.broadcast %57 : vector<64x1xf32> to vector<64x128xf32>
    %69 = arith.subf %46, %68 : vector<64x128xf32>
    %70 = vector.broadcast %67 : vector<64x1xf32> to vector<64x128xf32>
    %71 = arith.mulf %69, %70 : vector<64x128xf32>
    %72 = vector.broadcast %48 : vector<64x1xf32> to vector<64x128xf32>
    %73 = arith.addf %71, %72 : vector<64x128xf32>
    %cst_28 = arith.constant 0.000000e+00 : f32
    %74 = vector.broadcast %cst_28 : f32 to vector<64x128xf32>
    %75 = arith.maximumf %73, %74 : vector<64x128xf32>
    %c2_29 = arith.constant 2 : index
    %c0_30 = arith.constant 0 : index
    %c0_31 = arith.constant 0 : index
    %76 = vector.load %arg1[%c2_29, %c0_30, %c0_31] : memref<6x128x128xf32, #tpu.memory_space<vmem>>, vector<1x128x64xf32>
    %77 = vector.shape_cast %76 : vector<1x128x64xf32> to vector<128x64xf32>
    %c0_32 = arith.constant 0 : index
    %c6 = arith.constant 6 : index
    %78 = vector.load %arg2[%c0_32, %c6] : memref<128x18xf32, #tpu.memory_space<vmem>>, vector<128x1xf32>
    %cst_33 = arith.constant dense<0.000000e+00> : vector<128x128xf32>
    %79 = tpu.matmul %77, %75, %cst_33 {dimension_numbers = #tpu.dot_dimension_numbers<[1], [0], [0], [1], [0, 0, 1, 1], [], []>} : vector<128x64xf32>, vector<64x128xf32>, vector<128x128xf32> -> vector<128x128xf32>
    %80 = vector.broadcast %78 : vector<128x1xf32> to vector<128x128xf32>
    %81 = arith.addf %79, %80 : vector<128x128xf32>
    %c0_34 = arith.constant 0 : index
    %c7 = arith.constant 7 : index
    %82 = vector.load %arg2[%c0_34, %c7] : memref<128x18xf32, #tpu.memory_space<vmem>>, vector<128x1xf32>
    %c0_35 = arith.constant 0 : index
    %c8 = arith.constant 8 : index
    %83 = vector.load %arg2[%c0_35, %c8] : memref<128x18xf32, #tpu.memory_space<vmem>>, vector<128x1xf32>
    %84 = vector.broadcast %4 : vector<1x128xf32> to vector<128x128xf32>
    %85 = arith.mulf %81, %84 : vector<128x128xf32>
    %cst_36 = arith.constant dense<0.000000e+00> : vector<128xf32>
    %86 = vector.multi_reduction <add>, %85, %cst_36 [1] : vector<128x128xf32> to vector<128xf32>
    %87 = vector.shape_cast %86 : vector<128xf32> to vector<128x1xf32>
    %88 = arith.mulf %85, %85 : vector<128x128xf32>
    %cst_37 = arith.constant dense<0.000000e+00> : vector<128xf32>
    %89 = vector.multi_reduction <add>, %88, %cst_37 [1] : vector<128x128xf32> to vector<128xf32>
    %90 = vector.shape_cast %89 : vector<128xf32> to vector<128x1xf32>
    %cst_38 = arith.constant 1.250000e-01 : f32
    %91 = vector.broadcast %cst_38 : f32 to vector<128x1xf32>
    %92 = arith.mulf %87, %91 : vector<128x1xf32>
    %cst_39 = arith.constant 1.250000e-01 : f32
    %93 = vector.broadcast %cst_39 : f32 to vector<128x1xf32>
    %94 = arith.mulf %90, %93 : vector<128x1xf32>
    %95 = arith.mulf %92, %92 : vector<128x1xf32>
    %96 = arith.subf %94, %95 : vector<128x1xf32>
    %cst_40 = arith.constant 0.000000e+00 : f32
    %97 = vector.broadcast %cst_40 : f32 to vector<128x1xf32>
    %98 = arith.maximumf %96, %97 : vector<128x1xf32>
    %cst_41 = arith.constant 9.99999974E-6 : f32
    %99 = vector.broadcast %cst_41 : f32 to vector<128x1xf32>
    %100 = arith.addf %98, %99 : vector<128x1xf32>
    %101 = math.rsqrt %100 : vector<128x1xf32>
    %102 = arith.mulf %82, %101 : vector<128x1xf32>
    %103 = vector.broadcast %92 : vector<128x1xf32> to vector<128x128xf32>
    %104 = arith.subf %81, %103 : vector<128x128xf32>
    %105 = vector.broadcast %102 : vector<128x1xf32> to vector<128x128xf32>
    %106 = arith.mulf %104, %105 : vector<128x128xf32>
    %107 = vector.broadcast %83 : vector<128x1xf32> to vector<128x128xf32>
    %108 = arith.addf %106, %107 : vector<128x128xf32>
    %cst_42 = arith.constant 0.000000e+00 : f32
    %109 = vector.broadcast %cst_42 : f32 to vector<128x128xf32>
    %110 = arith.maximumf %108, %109 : vector<128x128xf32>
    %c3_43 = arith.constant 3 : index
    %c0_44 = arith.constant 0 : index
    %c0_45 = arith.constant 0 : index
    %111 = vector.load %arg1[%c3_43, %c0_44, %c0_45] : memref<6x128x128xf32, #tpu.memory_space<vmem>>, vector<1x64x128xf32>
    %112 = vector.shape_cast %111 : vector<1x64x128xf32> to vector<64x128xf32>
    %c0_46 = arith.constant 0 : index
    %c9 = arith.constant 9 : index
    %113 = vector.load %arg2[%c0_46, %c9] : memref<128x18xf32, #tpu.memory_space<vmem>>, vector<64x1xf32>
    %cst_47 = arith.constant dense<0.000000e+00> : vector<64x128xf32>
    %114 = tpu.matmul %112, %110, %cst_47 {dimension_numbers = #tpu.dot_dimension_numbers<[1], [0], [0], [1], [0, 0, 1, 1], [], []>} : vector<64x128xf32>, vector<128x128xf32>, vector<64x128xf32> -> vector<64x128xf32>
    %115 = vector.broadcast %113 : vector<64x1xf32> to vector<64x128xf32>
    %116 = arith.addf %114, %115 : vector<64x128xf32>
    %c0_48 = arith.constant 0 : index
    %c10 = arith.constant 10 : index
    %117 = vector.load %arg2[%c0_48, %c10] : memref<128x18xf32, #tpu.memory_space<vmem>>, vector<64x1xf32>
    %c0_49 = arith.constant 0 : index
    %c11 = arith.constant 11 : index
    %118 = vector.load %arg2[%c0_49, %c11] : memref<128x18xf32, #tpu.memory_space<vmem>>, vector<64x1xf32>
    %119 = vector.broadcast %4 : vector<1x128xf32> to vector<64x128xf32>
    %120 = arith.mulf %116, %119 : vector<64x128xf32>
    %cst_50 = arith.constant dense<0.000000e+00> : vector<64xf32>
    %121 = vector.multi_reduction <add>, %120, %cst_50 [1] : vector<64x128xf32> to vector<64xf32>
    %122 = vector.shape_cast %121 : vector<64xf32> to vector<64x1xf32>
    %123 = arith.mulf %120, %120 : vector<64x128xf32>
    %cst_51 = arith.constant dense<0.000000e+00> : vector<64xf32>
    %124 = vector.multi_reduction <add>, %123, %cst_51 [1] : vector<64x128xf32> to vector<64xf32>
    %125 = vector.shape_cast %124 : vector<64xf32> to vector<64x1xf32>
    %cst_52 = arith.constant 1.250000e-01 : f32
    %126 = vector.broadcast %cst_52 : f32 to vector<64x1xf32>
    %127 = arith.mulf %122, %126 : vector<64x1xf32>
    %cst_53 = arith.constant 1.250000e-01 : f32
    %128 = vector.broadcast %cst_53 : f32 to vector<64x1xf32>
    %129 = arith.mulf %125, %128 : vector<64x1xf32>
    %130 = arith.mulf %127, %127 : vector<64x1xf32>
    %131 = arith.subf %129, %130 : vector<64x1xf32>
    %cst_54 = arith.constant 0.000000e+00 : f32
    %132 = vector.broadcast %cst_54 : f32 to vector<64x1xf32>
    %133 = arith.maximumf %131, %132 : vector<64x1xf32>
    %cst_55 = arith.constant 9.99999974E-6 : f32
    %134 = vector.broadcast %cst_55 : f32 to vector<64x1xf32>
    %135 = arith.addf %133, %134 : vector<64x1xf32>
    %136 = math.rsqrt %135 : vector<64x1xf32>
    %137 = arith.mulf %117, %136 : vector<64x1xf32>
    %138 = vector.broadcast %127 : vector<64x1xf32> to vector<64x128xf32>
    %139 = arith.subf %116, %138 : vector<64x128xf32>
    %140 = vector.broadcast %137 : vector<64x1xf32> to vector<64x128xf32>
    %141 = arith.mulf %139, %140 : vector<64x128xf32>
    %142 = vector.broadcast %118 : vector<64x1xf32> to vector<64x128xf32>
    %143 = arith.addf %141, %142 : vector<64x128xf32>
    %cst_56 = arith.constant 0.000000e+00 : f32
    %144 = vector.broadcast %cst_56 : f32 to vector<64x128xf32>
    %145 = arith.maximumf %143, %144 : vector<64x128xf32>
    %146 = arith.addf %145, %75 : vector<64x128xf32>
    %c4_57 = arith.constant 4 : index
    %c0_58 = arith.constant 0 : index
    %c0_59 = arith.constant 0 : index
    %147 = vector.load %arg1[%c4_57, %c0_58, %c0_59] : memref<6x128x128xf32, #tpu.memory_space<vmem>>, vector<1x32x64xf32>
    %148 = vector.shape_cast %147 : vector<1x32x64xf32> to vector<32x64xf32>
    %c0_60 = arith.constant 0 : index
    %c12 = arith.constant 12 : index
    %149 = vector.load %arg2[%c0_60, %c12] : memref<128x18xf32, #tpu.memory_space<vmem>>, vector<32x1xf32>
    %cst_61 = arith.constant dense<0.000000e+00> : vector<32x128xf32>
    %150 = tpu.matmul %148, %146, %cst_61 {dimension_numbers = #tpu.dot_dimension_numbers<[1], [0], [0], [1], [0, 0, 1, 1], [], []>} : vector<32x64xf32>, vector<64x128xf32>, vector<32x128xf32> -> vector<32x128xf32>
    %151 = vector.broadcast %149 : vector<32x1xf32> to vector<32x128xf32>
    %152 = arith.addf %150, %151 : vector<32x128xf32>
    %c0_62 = arith.constant 0 : index
    %c13 = arith.constant 13 : index
    %153 = vector.load %arg2[%c0_62, %c13] : memref<128x18xf32, #tpu.memory_space<vmem>>, vector<32x1xf32>
    %c0_63 = arith.constant 0 : index
    %c14 = arith.constant 14 : index
    %154 = vector.load %arg2[%c0_63, %c14] : memref<128x18xf32, #tpu.memory_space<vmem>>, vector<32x1xf32>
    %155 = vector.broadcast %4 : vector<1x128xf32> to vector<32x128xf32>
    %156 = arith.mulf %152, %155 : vector<32x128xf32>
    %cst_64 = arith.constant dense<0.000000e+00> : vector<32xf32>
    %157 = vector.multi_reduction <add>, %156, %cst_64 [1] : vector<32x128xf32> to vector<32xf32>
    %158 = vector.shape_cast %157 : vector<32xf32> to vector<32x1xf32>
    %159 = arith.mulf %156, %156 : vector<32x128xf32>
    %cst_65 = arith.constant dense<0.000000e+00> : vector<32xf32>
    %160 = vector.multi_reduction <add>, %159, %cst_65 [1] : vector<32x128xf32> to vector<32xf32>
    %161 = vector.shape_cast %160 : vector<32xf32> to vector<32x1xf32>
    %cst_66 = arith.constant 1.250000e-01 : f32
    %162 = vector.broadcast %cst_66 : f32 to vector<32x1xf32>
    %163 = arith.mulf %158, %162 : vector<32x1xf32>
    %cst_67 = arith.constant 1.250000e-01 : f32
    %164 = vector.broadcast %cst_67 : f32 to vector<32x1xf32>
    %165 = arith.mulf %161, %164 : vector<32x1xf32>
    %166 = arith.mulf %163, %163 : vector<32x1xf32>
    %167 = arith.subf %165, %166 : vector<32x1xf32>
    %cst_68 = arith.constant 0.000000e+00 : f32
    %168 = vector.broadcast %cst_68 : f32 to vector<32x1xf32>
    %169 = arith.maximumf %167, %168 : vector<32x1xf32>
    %cst_69 = arith.constant 9.99999974E-6 : f32
    %170 = vector.broadcast %cst_69 : f32 to vector<32x1xf32>
    %171 = arith.addf %169, %170 : vector<32x1xf32>
    %172 = math.rsqrt %171 : vector<32x1xf32>
    %173 = arith.mulf %153, %172 : vector<32x1xf32>
    %174 = vector.broadcast %163 : vector<32x1xf32> to vector<32x128xf32>
    %175 = arith.subf %152, %174 : vector<32x128xf32>
    %176 = vector.broadcast %173 : vector<32x1xf32> to vector<32x128xf32>
    %177 = arith.mulf %175, %176 : vector<32x128xf32>
    %178 = vector.broadcast %154 : vector<32x1xf32> to vector<32x128xf32>
    %179 = arith.addf %177, %178 : vector<32x128xf32>
    %cst_70 = arith.constant 0.000000e+00 : f32
    %180 = vector.broadcast %cst_70 : f32 to vector<32x128xf32>
    %181 = arith.maximumf %179, %180 : vector<32x128xf32>
    %182 = arith.addf %181, %40 : vector<32x128xf32>
    %c5_71 = arith.constant 5 : index
    %c0_72 = arith.constant 0 : index
    %c0_73 = arith.constant 0 : index
    %183 = vector.load %arg1[%c5_71, %c0_72, %c0_73] : memref<6x128x128xf32, #tpu.memory_space<vmem>>, vector<1x8x32xf32>
    %184 = vector.shape_cast %183 : vector<1x8x32xf32> to vector<8x32xf32>
    %c0_74 = arith.constant 0 : index
    %c15 = arith.constant 15 : index
    %185 = vector.load %arg2[%c0_74, %c15] : memref<128x18xf32, #tpu.memory_space<vmem>>, vector<8x1xf32>
    %cst_75 = arith.constant dense<0.000000e+00> : vector<8x128xf32>
    %186 = tpu.matmul %184, %182, %cst_75 {dimension_numbers = #tpu.dot_dimension_numbers<[1], [0], [0], [1], [0, 0, 1, 1], [], []>} : vector<8x32xf32>, vector<32x128xf32>, vector<8x128xf32> -> vector<8x128xf32>
    %187 = vector.broadcast %185 : vector<8x1xf32> to vector<8x128xf32>
    %188 = arith.addf %186, %187 : vector<8x128xf32>
    %c0_76 = arith.constant 0 : index
    %c0_77 = arith.constant 0 : index
    %189 = vector.load %arg3[%c0_76, %c0_77] : memref<8x128xf32, #tpu.memory_space<vmem>>, vector<8x128xf32>
    tpu.vector_store %arg3[%c0_76, %c0_77], %188 {strides = array<i32>} : memref<8x128xf32, #tpu.memory_space<vmem>>, vector<8x128xf32>,
    return
  }
}

</mosaic_0001>

<bundles_post_ra>
// kernel: congestion_autoencoder.1
= control target key start
LH: loop header
LB: loop body
LE: loop exit
PB: predicated region body
PF: predicated region fallthrough
CT: control target
= control target key end

     0   :  { %8 = vsyncpa [#allocation3], 0  ;;  %s2631_s12 = smov [#allocation2]   ;;  %s3515_s0 = inlined_call_operand.vmem [shape: f32[16,128], index: 0, kind: input, shape index: {}]   ;;  %s3516_s1 = inlined_call_operand.hbm [shape: f32[6,128,128], index: 1, kind: input, shape index: {}]   ;;  %s3517_s2 = inlined_call_operand.vmem [shape: f32[128,18], index: 2, kind: input, shape index: {}]   ;;  %s3518_s3 = inlined_call_operand.vmem [shape: f32[8,128], index: 3, kind: output, shape index: {}]  }
   0x1   :  { %s16_s13 = sshll.u32 %s2631_s12, 4  ;;  %s2607_s16 = scalar_lea.hbm %s3516_s1, 12288  ;;  %s17_s13 = int_to_ptr.vmem [resolvable:$true] %s16_s13 }
   0x2   :  { %p2608_p0 = scmp.ne.s32.totalorder %s3516_s1, %s2607_s16  ;;  %p2611_p1 = scmp.lt.u32.totalorder %s2607_s16, %s3516_s1 }
   0x4   :  { %p2613_p2 = pnand %p2611_p1, %p2608_p0 }
   0x6   :  { %2616 = shalt.err (!%p2613_p2)
}
   0x7   :  { %s2617_s21 = scalar_lea.vmem %s17_s13, 12288  ;;  %p2622_p4 = scmp.lt.s32.totalorder %s17_s13, %s17_s13 }
   0x8   :  { %p2618_p3 = scmp.ne.s32.totalorder %s17_s13, %s2617_s21  ;;  %p2623_p5 = scmp.lt.s32.totalorder %s2617_s21, %s2617_s21 }
   0xa   :  { %p2624_p6 = por %p2623_p5, %p2622_p4 }
   0xc   :  { %p2625_p7 = pnand %p2624_p6, %p2618_p3 }
   0xe   :  { %2628 = shalt.err (!%p2625_p7)
}
   0xf   :  { %s2632_s22 = smov 128   ;;  %s2633_s23 = smov 8  }
  0x10   :  { %22 = dma.hbm_to_vmem [thread:$0]  %s3516_s1, 12288, %s17_s13, [#allocation3], %s2632_s22, %s2632_s22, %s2633_s23  }
  0x11   :  { %2629 = dma.done.wait [#allocation3], 12288  }
  0x12   :  { %2630 = vsyncadd [#allocation3], 4294955008  ;;  %v2634_v0 = vmov 0   ;;  %vm63_vm0 = vcmask 130048   ;;  %v33_v1 = vld [vmem:[%s3515_s0] sm:$0xff]  ;;  %v34_v2 = vld [vmem:[%s3515_s0 + $0x8] sm:$0xff]  ;;  %v28_v12 = vlaneseq }
  0x13   :  { %2466 = vset.pattern.permute.xlu0 %v2634_v0  ;;  %2467 = vset.pattern.permute.xlu1 %v2634_v0  ;;  %v35_v3 = vld [vmem:[#allocation2] sm:$0xff]  ;;  %v2362_v4 = vpack.c.bf16 %v34_v2, %v33_v1  ;;  %v2695_v5 = vld [vmem:[%s3517_s2] sm:$0xff]  ;;  %v2700_v6 = vld [vmem:[%s3517_s2 + $0x10] sm:$0xff]  ;;  %v3523_v17 = vmov 0.0   ;;  %v2636_v36 = vmov 2   ;;  %v2637_v37 = vmov 1  }
  0x14   :  { %2219 = vmatprep.mubr.msk.f32.mxu0 %vm63_vm0, %v35_v3  ;;  %45 = vperm.xlu0 %2466, %v2695_v5   ;;  %v36_v7 = vld [vmem:[#allocation2 + $0x8] sm:$0xff]  ;;  %v2706_v8 = vld [vmem:[%s3517_s2 + $0x8] sm:$0xff]  ;;  %v2712_v10 = vld [vmem:[%s3517_s2 + $0x18] sm:$0xff]  ;;  %v29_v14 = vand.u32 127, %v28_v12  ;;  %vm326_vm2 = vcmask 261120   ;;  %vm785_vm3 = vcmask 523264  }
  0x15   :  { %2363 = vmatprep.subr.bf16.mxu0 %v2362_v4  ;;  %55 = vperm.xlu1 %2467, %v2700_v6   ;;  %v37_v9 = vld [vmem:[#allocation2 + $0x10] sm:$0xff]  ;;  %v38_v11 = vld [vmem:[#allocation2 + $0x18] sm:$0xff]  ;;  %vm2651_vm4 = vmmov 0  }
  0x16   :  { %2365 = vmatpush3.bf16.msra.mxu0 %v2362_v4  ;;  %vm30_vm1 = vcmp.lt.s32.totalorder %v29_v14, 8 }
  0x17   :  { %v2720_v18 = vsel %vm30_vm1, 1.0, %v3523_v17 }
  0x18   :  { %50 = vperm.xlu0 %2466, %v2706_v8   ;;  %3554 = vst [vmem:[#allocation5_spill] sm:$0xff] %v2720_v18 }
  0x19   :  { %2220 = vmatmul.mubr.msk.f32.vlgmr.msra.gmra.mrb[0].mxu0 %vm63_vm0, %v36_v7  ;;  %60 = vperm.xlu1 %2467, %v2712_v10  }
  0x1a   :  { %2222 = vmatprep.mubr.msk.f32.mxu0 %vm63_vm0, %v37_v9 }
  0x1c   :  { %2468 = vset.pattern.permute.xlu0 %v2637_v37 }
  0x1d   :  { %2223 = vmatmul.mubr.msk.f32.gmra.mrb[2].mxu0 %vm63_vm0, %v38_v11  ;;  %2469 = vset.pattern.permute.xlu1 %v2636_v36 }
  0x93   :  { %v46_v13 = vpop.permute.xlu0 %45 }
  0x94   :  { %v56_v22 = vpop.permute.xlu1 %55 }
  0x97   :  { %v51_v15 = vpop.permute.xlu0 %50 }
  0x98   :  { %v61_v30 = vpop.permute.xlu1 %60 }
  0xec   :  { %v2221_v16 = vpop.f32.mrb[0].mxu0 }
  0xed   :  { %v2722_v19 = vadd.f32 %v2221_v16, %v51_v15  ;;  %v142_v20 = vpop.f32.mrb[1].mxu0 }
  0xee   :  { %v2724_v21 = vadd.f32 %v142_v20, %v46_v13 }
  0xef   :  { %v162_v23 = vmul.f32 %v2720_v18, %v2722_v19 }
  0xf0   :  { %v2224_v24 = vpop.f32.mrb[2].mxu0  ;;  %v161_v25 = vmul.f32 %v2720_v18, %v2724_v21 }
  0xf1   :  { %167 = vadd.xlane.f32.xlu1 %v162_v23  ;;  %v152_v26 = vpop.f32.mrb[3].mxu0  ;;  %v174_v29 = vmul.f32 %v162_v23, %v162_v23  ;;  %v2734_v32 = vadd.f32 %v2224_v24, %v61_v30  ;;  %v2638_v23 = vmov 3   ;;  %v2768_v24 = vld [vmem:[%s3517_s2 + $0x28] sm:$0xff] }
  0xf2   :  { %v2730_v27 = vadd.f32 %v152_v26, %v56_v22  ;;  %165 = vadd.xlane.f32.xlu0 %v161_v25  ;;  %v173_v33 = vmul.f32 %v161_v25, %v161_v25  ;;  %v270_v22 = vld [vmem:[#allocation2 + $0x80] sm:$0xff]  ;;  %v2782_v26 = vld [vmem:[%s3517_s2 + $0x20] sm:$0xff] }
  0xf3   :  { %v164_v34 = vmul.f32 %v2720_v18, %v2734_v32  ;;  %2233 = vmatprep.mubr.msk.f32.mxu1 %vm326_vm2, %v270_v22  ;;  %v2775_v25 = vld [vmem:[%s3517_s2 + $0x38] sm:$0xff] }
  0xf4   :  { %v163_v28 = vmul.f32 %v2720_v18, %v2730_v27 }
  0xf5   :  { %v176_v35 = vmul.f32 %v164_v34, %v164_v34 }
  0xf6   :  { %169 = vadd.xlane.f32.xlu1 %v163_v28  ;;  %179 = vadd.xlane.f32.xlu0 %v174_v29  ;;  %v175_v31 = vmul.f32 %v163_v28, %v163_v28  ;;  %v2788_v28 = vld [vmem:[%s3517_s2 + $0x30] sm:$0xff] }
  0xfa   :  { %177 = vadd.xlane.f32.xlu0 %v173_v33  ;;  %181 = vadd.xlane.f32.xlu1 %v175_v31 }
  0xfe   :  { %171 = vadd.xlane.f32.xlu0 %v164_v34 }
 0x102   :  { %183 = vadd.xlane.f32.xlu0 %v176_v35 }
 0x10b   :  { %246 = vperm.xlu1 %2469, %v2695_v5  }
 0x10f   :  { %250 = vperm.xlu1 %2469, %v2706_v8  }
 0x113   :  { %254 = vperm.xlu1 %2469, %v2700_v6  }
 0x117   :  { %2470 = vset.pattern.permute.xlu1 %v2637_v37 }
 0x17e   :  { %v168_v38 = vpop.xlane.xlu1 %167 }
 0x17f   :  { %v166_v39 = vpop.xlane.xlu0 %165  ;;  %v2741_v40 = vmul.f32 0.125, %v168_v38 }
 0x180   :  { %v2745_v44 = vmul.f32 0.125, %v166_v39 }
 0x181   :  { %v194_v43 = vmul.f32 %v2741_v40, %v2741_v40  ;;  %v218_v31 = vsub.f32 %v2722_v19, %v2741_v40 }
 0x182   :  { %v193_v49 = vmul.f32 %v2745_v44, %v2745_v44 }
 0x183   :  { %v170_v41 = vpop.xlane.xlu1 %169  ;;  %v180_v42 = vpop.xlane.xlu0 %179 }
 0x184   :  { %v190_v45 = vmul.f32 0.125, %v180_v42  ;;  %v2749_v50 = vmul.f32 0.125, %v170_v41 }
 0x186   :  { %v198_v46 = vsub.f32 %v190_v45, %v194_v43  ;;  %v195_v53 = vmul.f32 %v2749_v50, %v2749_v50 }
 0x187   :  { %v178_v47 = vpop.xlane.xlu0 %177  ;;  %v182_v48 = vpop.xlane.xlu1 %181 }
 0x188   :  { %v202_v51 = vmax.f32 %v198_v46, 0.0  ;;  %v189_v52 = vmul.f32 0.125, %v178_v47  ;;  %v191_v56 = vmul.f32 0.125, %v182_v48 }
 0x18a   :  { %v206_v54 = vadd.f32 1e-05, %v202_v51  ;;  %v197_v55 = vsub.f32 %v189_v52, %v193_v49  ;;  %v199_v61 = vsub.f32 %v191_v56, %v195_v53  ;;  %v275_v56 = vld [vmem:[#allocation2 + $0xa8] sm:$0xff] }
 0x18b   :  { %v172_v57 = vpop.xlane.xlu0 %171  ;;  %v247_v29 = vpop.permute.xlu1 %246 }
 0x18c   :  { %2515 = vrsqrt.f32 %v206_v54  ;;  %v201_v58 = vmax.f32 %v197_v55, 0.0  ;;  %v2753_v59 = vmul.f32 0.125, %v172_v57  ;;  %v203_v1 = vmax.f32 %v199_v61, 0.0  ;;  %v272_v54 = vld [vmem:[#allocation2 + $0x90] sm:$0xff]  ;;  %v274_v55 = vld [vmem:[#allocation2 + $0xa0] sm:$0xff] }
 0x18d   :  { %v276_v57 = vld [vmem:[#allocation2 + $0xb0] sm:$0xff] }
 0x18e   :  { %v205_v60 = vadd.f32 1e-05, %v201_v58  ;;  %v196_v63 = vmul.f32 %v2753_v59, %v2753_v59  ;;  %v207_v7 = vadd.f32 1e-05, %v203_v1  ;;  %v220_v46 = vsub.f32 %v2734_v32, %v2753_v59  ;;  %v273_v32 = vld [vmem:[#allocation2 + $0x98] sm:$0xff] }
 0x18f   :  { %v184_v62 = vpop.xlane.xlu0 %183  ;;  %v251_v30 = vpop.permute.xlu1 %250  ;;  %v277_v58 = vld [vmem:[#allocation2 + $0xb8] sm:$0xff]  ;;  %v2639_v59 = vmov 5  }
 0x190   :  { %2517 = vrsqrt.f32 %v205_v60  ;;  %v192_v0 = vmul.f32 0.125, %v184_v62 }
 0x192   :  { %v200_v2 = vsub.f32 %v192_v0, %v196_v63 }
 0x193   :  { %v255_v33 = vpop.permute.xlu1 %254 }
 0x194   :  { %v204_v3 = vmax.f32 %v200_v2, 0.0 }
 0x196   :  { %v2516_v4 = vpop.eup %2515  ;;  %v208_v9 = vadd.f32 1e-05, %v204_v3 }
 0x197   :  { %v214_v11 = vmul.f32 %v2516_v4, %v2706_v8 }
 0x198   :  { %2519 = vrsqrt.f32 %v208_v9 }
 0x199   :  { %228 = vperm.xlu0 %2468, %v214_v11   ;;  %2521 = vrsqrt.f32 %v207_v7 }
 0x19a   :  { %v2518_v12 = vpop.eup %2517 }
 0x19b   :  { %v213_v13 = vmul.f32 %v2518_v12, %v2695_v5 }
 0x19d   :  { %223 = vperm.xlu1 %2470, %v213_v13   ;;  %2473 = vset.pattern.permute.xlu0 %v2638_v23 }
 0x19e   :  { %298 = vperm.xlu0 %2473, %v2700_v6  }
 0x1a2   :  { %v2520_v14 = vpop.eup %2519  ;;  %313 = vperm.xlu0 %2473, %v2768_v24  }
 0x1a3   :  { %v216_v15 = vmul.f32 %v2520_v14, %v2712_v10  ;;  %v2522_v16 = vpop.eup %2521 }
 0x1a4   :  { %v215_v20 = vmul.f32 %v2522_v16, %v2700_v6 }
 0x1a5   :  { %238 = vperm.xlu1 %2470, %v216_v15  }
 0x1a6   :  { %323 = vperm.xlu0 %2473, %v2775_v25  }
 0x1a9   :  { %233 = vperm.xlu1 %2470, %v215_v20  }
 0x1ad   :  { %2471 = vset.pattern.permute.xlu1 %v2636_v36  ;;  %v217_v36 = vsub.f32 %v2724_v21, %v2745_v44  ;;  %v219_v21 = vsub.f32 %v2730_v27, %v2749_v50  ;;  %v271_v50 = vld [vmem:[#allocation2 + $0x88] sm:$0xff] }
 0x1ae   :  { %258 = vperm.xlu1 %2471, %v2712_v10  }
 0x1b2   :  { %2472 = vset.pattern.permute.xlu1 %v2638_v23 }
 0x1b3   :  { %288 = vperm.xlu1 %2472, %v2695_v5  }
 0x1b7   :  { %293 = vperm.xlu1 %2472, %v2706_v8  }
 0x1bb   :  { %303 = vperm.xlu1 %2472, %v2712_v10  }
 0x1bf   :  { %308 = vperm.xlu1 %2472, %v2782_v26  }
 0x1c3   :  { %318 = vperm.xlu1 %2472, %v2788_v28  }
 0x1c7   :  { %2474 = vset.pattern.permute.xlu1 %v2639_v59 }
 0x218   :  { %v229_v34 = vpop.permute.xlu0 %228 }
 0x219   :  { %v242_v35 = vmul.f32 %v229_v34, %v218_v31 }
 0x21b   :  { %v2795_v38 = vadd.f32 %v251_v30, %v242_v35 }
 0x21c   :  { %v224_v37 = vpop.permute.xlu1 %223 }
 0x21d   :  { %3555 = vst [vmem:[#allocation6_spill] sm:$0xff] %v2795_v38  ;;  %v241_v39 = vmul.f32 %v224_v37, %v217_v36  ;;  %v3521_v43 = vmax.f32 %v2795_v38, 0.0  ;;  %v299_v7 = vpop.permute.xlu0 %298 }
 0x21f   :  { %v2797_v41 = vadd.f32 %v247_v29, %v241_v39 }
 0x221   :  { %3556 = vst [vmem:[#allocation7_spill] sm:$0xff] %v2797_v41  ;;  %v3522_v42 = vmax.f32 %v2797_v41, 0.0  ;;  %v314_v35 = vpop.permute.xlu0 %313 }
 0x223   :  { %v2366_v19 = vpack.c.bf16 %v3521_v43, %v3522_v42 }
 0x224   :  { %v239_v40 = vpop.permute.xlu1 %238 }
 0x225   :  { %2367 = vmatprep.subr.bf16.mxu1 %v2366_v19  ;;  %v244_v47 = vmul.f32 %v239_v40, %v220_v46  ;;  %v324_v40 = vpop.permute.xlu0 %323 }
 0x226   :  { %2369 = vmatpush3.bf16.msra.mxu1 %v2366_v19 }
 0x228   :  { %v234_v44 = vpop.permute.xlu1 %233 }
 0x229   :  { %v243_v45 = vmul.f32 %v234_v44, %v219_v21 }
 0x22b   :  { %v2809_v48 = vadd.f32 %v255_v33, %v243_v45 }
 0x22d   :  { %3557 = vst [vmem:[#allocation8_spill] sm:$0xff] %v2809_v48  ;;  %v259_v49 = vpop.permute.xlu1 %258  ;;  %v3520_v52 = vmax.f32 %v2809_v48, 0.0 }
 0x22e   :  { %v2811_v51 = vadd.f32 %v259_v49, %v244_v47 }
 0x230   :  { %3558 = vst [vmem:[#allocation9_spill] sm:$0xff] %v2811_v51  ;;  %v3519_v53 = vmax.f32 %v2811_v51, 0.0 }
 0x232   :  { %v2370_v27 = vpack.c.bf16 %v3519_v53, %v3520_v52  ;;  %v289_v60 = vpop.permute.xlu1 %288 }
 0x234   :  { %2371 = vmatprep.subr.bf16.mxu1 %v2370_v27 }
 0x235   :  { %2373 = vmatpush3.bf16.msra.mxu1 %v2370_v27 }
 0x236   :  { %v294_v61 = vpop.permute.xlu1 %293 }
 0x238   :  { %2234 = vmatmul.mubr.msk.f32.vlgmr.msra.gmra.mrb[0].mxu1 %vm326_vm2, %v271_v50 }
 0x239   :  { %2236 = vmatprep.mubr.msk.f32.mxu1 %vm326_vm2, %v272_v54 }
 0x23a   :  { %v304_v13 = vpop.permute.xlu1 %303 }
 0x23c   :  { %2237 = vmatmul.mubr.msk.f32.gmra.mrb[2].mxu1 %vm326_vm2, %v273_v32  ;;  %v2640_v32 = vmov 4  }
 0x23d   :  { %2239 = vmatprep.mubr.msk.f32.mxu1 %vm326_vm2, %v274_v55  ;;  %2476 = vset.pattern.permute.xlu0 %v2640_v32 }
 0x23e   :  { %v309_v33 = vpop.permute.xlu1 %308 }
 0x240   :  { %2240 = vmatmul.mubr.msk.f32.gmra.mrb[4].mxu1 %vm326_vm2, %v275_v56 }
 0x241   :  { %2242 = vmatprep.mubr.msk.f32.mxu1 %vm326_vm2, %v276_v57 }
 0x242   :  { %v319_v21 = vpop.permute.xlu1 %318 }
 0x244   :  { %2243 = vmatmul.mubr.msk.f32.gmra.mrb[6].mxu1 %vm326_vm2, %v277_v58 }
 0x30b   :  { %v2235_v62 = vpop.f32.mrb[0].mxu1 }
 0x30c   :  { %v2827_v63 = vadd.f32 %v2235_v62, %v294_v61  ;;  %v417_v0 = vpop.f32.mrb[1].mxu1 }
 0x30d   :  { %v2829_v1 = vadd.f32 %v417_v0, %v289_v60 }
 0x30e   :  { %v457_v2 = vmul.f32 %v2720_v18, %v2827_v63 }
 0x30f   :  { %v2238_v3 = vpop.f32.mrb[2].mxu1  ;;  %v456_v4 = vmul.f32 %v2720_v18, %v2829_v1 }
 0x310   :  { %466 = vadd.xlane.f32.xlu0 %v457_v2  ;;  %v427_v9 = vpop.f32.mrb[3].mxu1  ;;  %v2837_v14 = vadd.f32 %v2238_v3, %v304_v13  ;;  %v481_v16 = vmul.f32 %v457_v2, %v457_v2 }
 0x311   :  { %464 = vadd.xlane.f32.xlu1 %v456_v4  ;;  %v2835_v11 = vadd.f32 %v427_v9, %v299_v7  ;;  %v480_v12 = vmul.f32 %v456_v4, %v456_v4 }
 0x312   :  { %v459_v29 = vmul.f32 %v2720_v18, %v2837_v14 }
 0x313   :  { %v2241_v15 = vpop.f32.mrb[4].mxu1  ;;  %v458_v22 = vmul.f32 %v2720_v18, %v2835_v11 }
 0x314   :  { %v437_v20 = vpop.f32.mrb[5].mxu1  ;;  %488 = vadd.xlane.f32.xlu0 %v480_v12  ;;  %v2845_v36 = vadd.f32 %v2241_v15, %v314_v35  ;;  %v483_v37 = vmul.f32 %v459_v29, %v459_v29 }
 0x315   :  { %490 = vadd.xlane.f32.xlu1 %v481_v16  ;;  %v482_v31 = vmul.f32 %v458_v22, %v458_v22  ;;  %v2843_v34 = vadd.f32 %v437_v20, %v309_v33 }
 0x316   :  { %v461_v19 = vmul.f32 %v2720_v18, %v2845_v36 }
 0x317   :  { %v2244_v23 = vpop.f32.mrb[6].mxu1  ;;  %v460_v39 = vmul.f32 %v2720_v18, %v2843_v34 }
 0x318   :  { %v447_v30 = vpop.f32.mrb[7].mxu1  ;;  %468 = vadd.xlane.f32.xlu0 %v458_v22  ;;  %v2853_v46 = vadd.f32 %v2244_v23, %v324_v40  ;;  %v485_v47 = vmul.f32 %v461_v19, %v461_v19 }
 0x319   :  { %470 = vadd.xlane.f32.xlu1 %v459_v29  ;;  %v2851_v44 = vadd.f32 %v447_v30, %v319_v21  ;;  %v484_v45 = vmul.f32 %v460_v39, %v460_v39 }
 0x31a   :  { %v463_v27 = vmul.f32 %v2720_v18, %v2853_v46 }
 0x31b   :  { %v462_v49 = vmul.f32 %v2720_v18, %v2851_v44 }
 0x31c   :  { %492 = vadd.xlane.f32.xlu0 %v482_v31  ;;  %v487_v54 = vmul.f32 %v463_v27, %v463_v27 }
 0x31d   :  { %494 = vadd.xlane.f32.xlu1 %v483_v37  ;;  %v486_v50 = vmul.f32 %v462_v49, %v462_v49 }
 0x320   :  { %472 = vadd.xlane.f32.xlu0 %v460_v39 }
 0x321   :  { %474 = vadd.xlane.f32.xlu1 %v461_v19 }
 0x324   :  { %496 = vadd.xlane.f32.xlu0 %v484_v45 }
 0x325   :  { %498 = vadd.xlane.f32.xlu1 %v485_v47 }
 0x328   :  { %476 = vadd.xlane.f32.xlu0 %v462_v49 }
 0x329   :  { %478 = vadd.xlane.f32.xlu1 %v463_v27 }
 0x32c   :  { %500 = vadd.xlane.f32.xlu0 %v486_v50 }
 0x32d   :  { %502 = vadd.xlane.f32.xlu1 %v487_v54 }
 0x33e   :  { %625 = vperm.xlu1 %2474, %v2695_v5  }
 0x342   :  { %629 = vperm.xlu1 %2474, %v2706_v8  }
 0x346   :  { %633 = vperm.xlu1 %2474, %v2700_v6  }
 0x34a   :  { %637 = vperm.xlu1 %2474, %v2712_v10  }
 0x34e   :  { %2475 = vset.pattern.permute.xlu1 %v2640_v32 }
 0x39d   :  { %v467_v55 = vpop.xlane.xlu0 %466 }
 0x39e   :  { %v465_v56 = vpop.xlane.xlu1 %464  ;;  %v2865_v57 = vmul.f32 0.125, %v467_v55 }
 0x39f   :  { %v2867_v58 = vmul.f32 0.125, %v465_v56 }
 0x3a0   :  { %v521_v2 = vmul.f32 %v2865_v57, %v2865_v57 }
 0x3a1   :  { %v520_v60 = vmul.f32 %v2867_v58, %v2867_v58  ;;  %v489_v61 = vpop.xlane.xlu0 %488 }
 0x3a2   :  { %v512_v62 = vmul.f32 0.125, %v489_v61  ;;  %v491_v0 = vpop.xlane.xlu1 %490 }
 0x3a3   :  { %v513_v3 = vmul.f32 0.125, %v491_v0 }
 0x3a4   :  { %v528_v4 = vsub.f32 %v512_v62, %v520_v60 }
 0x3a5   :  { %v529_v7 = vsub.f32 %v513_v3, %v521_v2  ;;  %v469_v9 = vpop.xlane.xlu0 %468 }
 0x3a6   :  { %v536_v12 = vmax.f32 %v528_v4, 0.0  ;;  %v2873_v13 = vmul.f32 0.125, %v469_v9  ;;  %v471_v15 = vpop.xlane.xlu1 %470 }
 0x3a7   :  { %v537_v16 = vmax.f32 %v529_v7, 0.0  ;;  %v2875_v20 = vmul.f32 0.125, %v471_v15 }
 0x3a8   :  { %v544_v22 = vadd.f32 1e-05, %v536_v12  ;;  %v522_v23 = vmul.f32 %v2873_v13, %v2873_v13 }
 0x3a9   :  { %v545_v29 = vadd.f32 1e-05, %v537_v16  ;;  %v493_v30 = vpop.xlane.xlu0 %492  ;;  %v523_v35 = vmul.f32 %v2875_v20, %v2875_v20 }
 0x3aa   :  { %2523 = vrsqrt.f32 %v544_v22  ;;  %v514_v31 = vmul.f32 0.125, %v493_v30  ;;  %v495_v33 = vpop.xlane.xlu1 %494 }
 0x3ab   :  { %2525 = vrsqrt.f32 %v545_v29  ;;  %v515_v37 = vmul.f32 0.125, %v495_v33 }
 0x3ac   :  { %v530_v39 = vsub.f32 %v514_v31, %v522_v23 }
 0x3ad   :  { %v531_v19 = vsub.f32 %v515_v37, %v523_v35  ;;  %v473_v40 = vpop.xlane.xlu0 %472 }
 0x3ae   :  { %v2881_v21 = vmul.f32 0.125, %v473_v40  ;;  %v475_v45 = vpop.xlane.xlu1 %474  ;;  %v538_v47 = vmax.f32 %v530_v39, 0.0 }
 0x3af   :  { %v539_v49 = vmax.f32 %v531_v19, 0.0  ;;  %v2883_v27 = vmul.f32 0.125, %v475_v45 }
 0x3b0   :  { %v524_v55 = vmul.f32 %v2881_v21, %v2881_v21  ;;  %v546_v61 = vadd.f32 1e-05, %v538_v47 }
 0x3b1   :  { %v547_v50 = vadd.f32 1e-05, %v539_v49  ;;  %v497_v54 = vpop.xlane.xlu0 %496  ;;  %v525_v62 = vmul.f32 %v2883_v27, %v2883_v27 }
 0x3b2   :  { %v516_v56 = vmul.f32 0.125, %v497_v54  ;;  %v499_v60 = vpop.xlane.xlu1 %498 }
 0x3b3   :  { %2527 = vrsqrt.f32 %v547_v50  ;;  %v517_v0 = vmul.f32 0.125, %v499_v60 }
 0x3b4   :  { %v2524_v2 = vpop.eup %2523  ;;  %v532_v3 = vsub.f32 %v516_v56, %v524_v55  ;;  %2529 = vrsqrt.f32 %v546_v61 }
 0x3b5   :  { %v2526_v4 = vpop.eup %2525  ;;  %v533_v7 = vsub.f32 %v517_v0, %v525_v62  ;;  %v477_v9 = vpop.xlane.xlu0 %476  ;;  %v560_v12 = vmul.f32 %v2524_v2, %v2695_v5 }
 0x3b6   :  { %v540_v15 = vmax.f32 %v532_v3, 0.0  ;;  %v2890_v16 = vmul.f32 0.125, %v477_v9  ;;  %v479_v22 = vpop.xlane.xlu1 %478  ;;  %v561_v23 = vmul.f32 %v2526_v4, %v2706_v8 }
 0x3b7   :  { %v541_v29 = vmax.f32 %v533_v7, 0.0  ;;  %v2893_v30 = vmul.f32 0.125, %v479_v22  ;;  %578 = vperm.xlu0 %2476, %v560_v12  }
 0x3b8   :  { %v548_v31 = vadd.f32 1e-05, %v540_v15  ;;  %583 = vperm.xlu1 %2475, %v561_v23   ;;  %v526_v37 = vmul.f32 %v2890_v16, %v2890_v16  ;;  %v673_v23 = vld [vmem:[#allocation2 + $0x100] sm:$0xff] }
 0x3b9   :  { %v549_v33 = vadd.f32 1e-05, %v541_v29  ;;  %v501_v35 = vpop.xlane.xlu0 %500  ;;  %v527_v40 = vmul.f32 %v2893_v30, %v2893_v30  ;;  %2261 = vmatprep.mubr.msk.f32.mxu0 %vm785_vm3, %v673_v23  ;;  %v2641_v29 = vmov 6  }
 0x3ba   :  { %2531 = vrsqrt.f32 %v548_v31  ;;  %v518_v39 = vmul.f32 0.125, %v501_v35  ;;  %v503_v19 = vpop.xlane.xlu1 %502  ;;  %v2964_v31 = vld [vmem:[%s3517_s2 + $0x78] sm:$0xff] }
 0x3bb   :  { %2533 = vrsqrt.f32 %v549_v33  ;;  %v519_v45 = vmul.f32 0.125, %v503_v19  ;;  %2477 = vset.pattern.permute.xlu0 %v2639_v59  ;;  %v2969_v33 = vld [vmem:[%s3517_s2 + $0x70] sm:$0xff] }
 0x3bc   :  { %v534_v47 = vsub.f32 %v518_v39, %v526_v37  ;;  %2478 = vset.pattern.permute.xlu1 %v2639_v59  ;;  %641 = vperm.xlu0 %2477, %v2782_v26  }
 0x3bd   :  { %v2528_v49 = vpop.eup %2527  ;;  %v535_v50 = vsub.f32 %v519_v45, %v527_v40  ;;  %645 = vperm.xlu1 %2478, %v2768_v24   ;;  %v568_v40 = vsub.f32 %v2829_v1, %v2867_v58 }
 0x3be   :  { %v542_v54 = vmax.f32 %v534_v47, 0.0  ;;  %v563_v56 = vmul.f32 %v2528_v49, %v2712_v10  ;;  %v2530_v60 = vpop.eup %2529  ;;  %v626_v35 = vpop.permute.xlu1 %625  ;;  %v569_v47 = vsub.f32 %v2827_v63, %v2865_v57  ;;  %v571_v63 = vsub.f32 %v2837_v14, %v2875_v20 }
 0x3bf   :  { %v543_v55 = vmax.f32 %v535_v50, 0.0  ;;  %v562_v2 = vmul.f32 %v2530_v60, %v2700_v6  ;;  %v573_v14 = vsub.f32 %v2845_v36, %v2883_v27 }
 0x3c0   :  { %2480 = vset.pattern.permute.xlu0 %v2640_v32  ;;  %v550_v61 = vadd.f32 1e-05, %v542_v54 }
 0x3c1   :  { %v551_v62 = vadd.f32 1e-05, %v543_v55  ;;  %2479 = vset.pattern.permute.xlu1 %v2640_v32 }
 0x3c2   :  { %593 = vperm.xlu1 %2479, %v563_v56   ;;  %v630_v37 = vpop.permute.xlu1 %629 }
 0x3c3   :  { %2535 = vrsqrt.f32 %v551_v62 }
 0x3c4   :  { %v2532_v0 = vpop.eup %2531  ;;  %2537 = vrsqrt.f32 %v550_v61 }
 0x3c5   :  { %v2534_v3 = vpop.eup %2533  ;;  %v564_v4 = vmul.f32 %v2532_v0, %v2782_v26 }
 0x3c6   :  { %588 = vperm.xlu1 %2479, %v562_v2   ;;  %v565_v7 = vmul.f32 %v2534_v3, %v2768_v24  ;;  %v634_v39 = vpop.permute.xlu1 %633  ;;  %v570_v2 = vsub.f32 %v2835_v11, %v2873_v13 }
 0x3c7   :  { %598 = vperm.xlu0 %2480, %v564_v4   ;;  %v572_v4 = vsub.f32 %v2843_v34, %v2881_v21 }
 0x3ca   :  { %603 = vperm.xlu1 %2479, %v565_v7   ;;  %v638_v19 = vpop.permute.xlu1 %637 }
 0x3cd   :  { %v2536_v9 = vpop.eup %2535 }
 0x3ce   :  { %2481 = vset.pattern.permute.xlu1 %v2639_v59  ;;  %v567_v12 = vmul.f32 %v2536_v9, %v2775_v25  ;;  %v2538_v15 = vpop.eup %2537 }
 0x3cf   :  { %649 = vperm.xlu1 %2481, %v2788_v28   ;;  %v566_v22 = vmul.f32 %v2538_v15, %v2788_v28 }
 0x3d0   :  { %613 = vperm.xlu0 %2480, %v567_v12  }
 0x3d3   :  { %2482 = vset.pattern.permute.xlu1 %v2640_v32  ;;  %v2957_v32 = vld [vmem:[%s3517_s2 + $0x60] sm:$0xff] }
 0x3d4   :  { %608 = vperm.xlu1 %2482, %v566_v22   ;;  %2484 = vset.pattern.permute.xlu0 %v2641_v29 }
 0x3d5   :  { %707 = vperm.xlu0 %2484, %v2695_v5   ;;  %v2933_v5 = vld [vmem:[%s3517_s2 + $0x40] sm:$0xff] }
 0x3d8   :  { %2483 = vset.pattern.permute.xlu1 %v2639_v59  ;;  %v2928_v59 = vld [vmem:[%s3517_s2 + $0x48] sm:$0xff] }
 0x3d9   :  { %653 = vperm.xlu1 %2483, %v2775_v25   ;;  %722 = vperm.xlu0 %2484, %v2712_v10   ;;  %v2952_v10 = vld [vmem:[%s3517_s2 + $0x68] sm:$0xff] }
 0x3dd   :  { %2485 = vset.pattern.permute.xlu1 %v2641_v29  ;;  %732 = vperm.xlu0 %2484, %v2768_v24  }
 0x3de   :  { %712 = vperm.xlu1 %2485, %v2706_v8   ;;  %v2945_v8 = vld [vmem:[%s3517_s2 + $0x50] sm:$0xff] }
 0x3e1   :  { %742 = vperm.xlu0 %2484, %v2775_v25  }
 0x3e2   :  { %717 = vperm.xlu1 %2485, %v2700_v6   ;;  %v2940_v6 = vld [vmem:[%s3517_s2 + $0x58] sm:$0xff] }
 0x3e5   :  { %752 = vperm.xlu0 %2484, %v2928_v59  }
 0x3e6   :  { %727 = vperm.xlu1 %2485, %v2782_v26  }
 0x3e9   :  { %762 = vperm.xlu0 %2484, %v2940_v6  }
 0x3ea   :  { %737 = vperm.xlu1 %2485, %v2788_v28  }
 0x3ed   :  { %772 = vperm.xlu0 %2484, %v2952_v10  }
 0x3ee   :  { %747 = vperm.xlu1 %2485, %v2933_v5  }
 0x3f1   :  { %782 = vperm.xlu0 %2484, %v2964_v31  }
 0x3f2   :  { %757 = vperm.xlu1 %2485, %v2945_v8  }
 0x3f6   :  { %767 = vperm.xlu1 %2485, %v2957_v32  }
 0x3fa   :  { %777 = vperm.xlu1 %2485, %v2969_v33  }
 0x436   :  { %v579_v45 = vpop.permute.xlu0 %578 }
 0x437   :  { %v616_v49 = vmul.f32 %v579_v45, %v568_v40  ;;  %v584_v50 = vpop.permute.xlu1 %583 }
 0x438   :  { %v617_v54 = vmul.f32 %v584_v50, %v569_v47  ;;  %v575_v47 = vsub.f32 %v2853_v46, %v2893_v30  ;;  %v676_v46 = vld [vmem:[#allocation2 + $0x118] sm:$0xff]  ;;  %v677_v30 = vld [vmem:[#allocation2 + $0x120] sm:$0xff] }
 0x439   :  { %v2977_v55 = vadd.f32 %v626_v35, %v616_v49 }
 0x43a   :  { %v2979_v56 = vadd.f32 %v630_v37, %v617_v54 }
 0x43b   :  { %3559 = vst [vmem:[#allocation10_spill] sm:$0xff] %v2977_v55  ;;  %v3531_v60 = vmax.f32 %v2977_v55, 0.0  ;;  %v642_v57 = vpop.permute.xlu0 %641 }
 0x43c   :  { %3560 = vst [vmem:[#allocation11_spill] sm:$0xff] %v2979_v56  ;;  %v3530_v61 = vmax.f32 %v2979_v56, 0.0  ;;  %v646_v62 = vpop.permute.xlu1 %645 }
 0x43e   :  { %v2374_v1 = vpack.c.bf16 %v3530_v61, %v3531_v60 }
 0x440   :  { %2375 = vmatprep.subr.bf16.mxu0 %v2374_v1 }
 0x441   :  { %v594_v58 = vpop.permute.xlu1 %593  ;;  %2377 = vmatpush3.bf16.msra.mxu0 %v2374_v1 }
 0x442   :  { %v619_v0 = vmul.f32 %v594_v58, %v571_v63  ;;  %v678_v58 = vld [vmem:[#allocation2 + $0x128] sm:$0xff] }
 0x444   :  { %v2993_v7 = vadd.f32 %v638_v19, %v619_v0  ;;  %v679_v0 = vld [vmem:[#allocation2 + $0x130] sm:$0xff] }
 0x445   :  { %v589_v3 = vpop.permute.xlu1 %588 }
 0x446   :  { %3561 = vst [vmem:[#allocation12_spill] sm:$0xff] %v2993_v7  ;;  %v618_v9 = vmul.f32 %v589_v3, %v570_v2  ;;  %v599_v12 = vpop.permute.xlu0 %598  ;;  %v3529_v23 = vmax.f32 %v2993_v7, 0.0  ;;  %v680_v2 = vld [vmem:[#allocation2 + $0x138] sm:$0xff]  ;;  %v681_v3 = vld [vmem:[#allocation2 + $0x140] sm:$0xff] }
 0x447   :  { %v620_v15 = vmul.f32 %v599_v12, %v572_v4  ;;  %v682_v4 = vld [vmem:[#allocation2 + $0x148] sm:$0xff]  ;;  %v684_v12 = vld [vmem:[#allocation2 + $0x158] sm:$0xff] }
 0x448   :  { %v2995_v22 = vadd.f32 %v634_v39, %v618_v9  ;;  %v574_v39 = vsub.f32 %v2851_v44, %v2890_v16  ;;  %v674_v16 = vld [vmem:[#allocation2 + $0x108] sm:$0xff]  ;;  %v683_v9 = vld [vmem:[#allocation2 + $0x150] sm:$0xff] }
 0x449   :  { %v604_v20 = vpop.permute.xlu1 %603  ;;  %v3001_v11 = vadd.f32 %v642_v57, %v620_v15  ;;  %v675_v57 = vld [vmem:[#allocation2 + $0x110] sm:$0xff]  ;;  %v685_v15 = vld [vmem:[#allocation2 + $0x160] sm:$0xff] }
 0x44a   :  { %3562 = vst [vmem:[#allocation13_spill] sm:$0xff] %v2995_v22  ;;  %v3528_v29 = vmax.f32 %v2995_v22, 0.0  ;;  %v621_v13 = vmul.f32 %v604_v20, %v573_v14  ;;  %v686_v14 = vld [vmem:[#allocation2 + $0x168] sm:$0xff]  ;;  %v687_v20 = vld [vmem:[#allocation2 + $0x170] sm:$0xff] }
 0x44b   :  { %3563 = vst [vmem:[#allocation14_spill] sm:$0xff] %v3001_v11  ;;  %v3527_v21 = vmax.f32 %v3001_v11, 0.0 }
 0x44c   :  { %v3003_v35 = vadd.f32 %v646_v62, %v621_v13  ;;  %v2378_v34 = vpack.c.bf16 %v3529_v23, %v3528_v29  ;;  %v688_v13 = vld [vmem:[#allocation2 + $0x178] sm:$0xff] }
 0x44e   :  { %3564 = vst [vmem:[#allocation15_spill] sm:$0xff] %v3003_v35  ;;  %v3526_v37 = vmax.f32 %v3003_v35, 0.0  ;;  %v650_v36 = vpop.permute.xlu1 %649  ;;  %2379 = vmatprep.subr.bf16.mxu0 %v2378_v34 }
 0x44f   :  { %2381 = vmatpush3.bf16.msra.mxu0 %v2378_v34  ;;  %v614_v40 = vpop.permute.xlu0 %613  ;;  %v3533_v34 = vmov 8  }
 0x450   :  { %v2382_v27 = vpack.c.bf16 %v3526_v37, %v3527_v21  ;;  %v623_v49 = vmul.f32 %v614_v40, %v575_v47  ;;  %2486 = vset.pattern.permute.xlu1 %v3533_v34  ;;  %2487 = vset.pattern.permute.xlu0 %v3533_v34 }
 0x452   :  { %2383 = vmatprep.subr.bf16.mxu0 %v2382_v27 }
 0x453   :  { %v609_v19 = vpop.permute.xlu1 %608  ;;  %2385 = vmatpush3.bf16.msra.mxu0 %v2382_v27 }
 0x454   :  { %v622_v45 = vmul.f32 %v609_v19, %v574_v39  ;;  %v708_v39 = vpop.permute.xlu0 %707 }
 0x456   :  { %v3019_v50 = vadd.f32 %v650_v36, %v622_v45 }
 0x458   :  { %3565 = vst [vmem:[#allocation16_spill] sm:$0xff] %v3019_v50  ;;  %v654_v54 = vpop.permute.xlu1 %653  ;;  %v3525_v1 = vmax.f32 %v3019_v50, 0.0 }
 0x459   :  { %v3021_v62 = vadd.f32 %v654_v54, %v623_v49 }
 0x45b   :  { %3566 = vst [vmem:[#allocation17_spill] sm:$0xff] %v3021_v62  ;;  %v3524_v63 = vmax.f32 %v3021_v62, 0.0 }
 0x45d   :  { %v2386_v44 = vpack.c.bf16 %v3524_v63, %v3525_v1  ;;  %v713_v36 = vpop.permute.xlu1 %712 }
 0x45f   :  { %2387 = vmatprep.subr.bf16.mxu0 %v2386_v44 }
 0x460   :  { %2389 = vmatpush3.bf16.msra.mxu0 %v2386_v44 }
 0x463   :  { %2262 = vmatmul.mubr.msk.f32.vlgmr.msra.gmra.mrb[4].mxu0 %vm785_vm3, %v674_v16  ;;  %v718_v16 = vpop.permute.xlu1 %717 }
 0x464   :  { %2264 = vmatprep.mubr.msk.f32.mxu0 %vm785_vm3, %v675_v57 }
 0x467   :  { %2265 = vmatmul.mubr.msk.f32.gmra.mrb[6].mxu0 %vm785_vm3, %v676_v46  ;;  %v723_v46 = vpop.permute.xlu0 %722 }
 0x468   :  { %2267 = vmatprep.mubr.msk.f32.mxu0 %vm785_vm3, %v677_v30 }
 0x46b   :  { %2268 = vmatmul.mubr.msk.f32.gmra.mrb[8].mxu0 %vm785_vm3, %v678_v58 }
 0x46c   :  { %2270 = vmatprep.mubr.msk.f32.mxu0 %vm785_vm3, %v679_v0 }
 0x46f   :  { %2271 = vmatmul.mubr.msk.f32.gmra.mrb[10].mxu0 %vm785_vm3, %v680_v2 }
 0x470   :  { %2273 = vmatprep.mubr.msk.f32.mxu0 %vm785_vm3, %v681_v3 }
 0x473   :  { %2274 = vmatmul.mubr.msk.f32.gmra.mrb[12].mxu0 %vm785_vm3, %v682_v4 }
 0x474   :  { %2276 = vmatprep.mubr.msk.f32.mxu0 %vm785_vm3, %v683_v9 }
 0x477   :  { %2277 = vmatmul.mubr.msk.f32.gmra.mrb[14].mxu0 %vm785_vm3, %v684_v12 }
 0x478   :  { %2279 = vmatprep.mubr.msk.f32.mxu0 %vm785_vm3, %v685_v15 }
 0x47b   :  { %2280 = vmatmul.mubr.msk.f32.gmra.mrb[16].mxu0 %vm785_vm3, %v686_v14  ;;  %v728_v14 = vpop.permute.xlu1 %727 }
 0x47c   :  { %2282 = vmatprep.mubr.msk.f32.mxu0 %vm785_vm3, %v687_v20  ;;  %v733_v20 = vpop.permute.xlu0 %732 }
 0x47f   :  { %2283 = vmatmul.mubr.msk.f32.gmra.mrb[18].mxu0 %vm785_vm3, %v688_v13 }
 0x536   :  { %v2263_v27 = vpop.f32.mrb[4].mxu0 }
 0x537   :  { %v3046_v19 = vadd.f32 %v2263_v27, %v713_v36  ;;  %v900_v40 = vpop.f32.mrb[5].mxu0 }
 0x538   :  { %v3048_v45 = vadd.f32 %v900_v40, %v708_v39 }
 0x539   :  { %v980_v47 = vmul.f32 %v2720_v18, %v3046_v19 }
 0x53a   :  { %v2266_v49 = vpop.f32.mrb[6].mxu0  ;;  %v979_v54 = vmul.f32 %v2720_v18, %v3048_v45 }
 0x53b   :  { %997 = vadd.xlane.f32.xlu0 %v980_v47  ;;  %v910_v44 = vpop.f32.mrb[7].mxu0  ;;  %v3056_v58 = vadd.f32 %v2266_v49, %v723_v46  ;;  %v1028_v2 = vmul.f32 %v980_v47, %v980_v47  ;;  %v743_v46 = vpop.permute.xlu0 %742 }
 0x53c   :  { %995 = vadd.xlane.f32.xlu1 %v979_v54  ;;  %v1027_v57 = vmul.f32 %v979_v54, %v979_v54  ;;  %v3054_v30 = vadd.f32 %v910_v44, %v718_v16 }
 0x53d   :  { %v982_v12 = vmul.f32 %v2720_v18, %v3056_v58 }
 0x53e   :  { %v2269_v0 = vpop.f32.mrb[8].mxu0  ;;  %v981_v4 = vmul.f32 %v2720_v18, %v3054_v30 }
 0x53f   :  { %v920_v3 = vpop.f32.mrb[9].mxu0  ;;  %1043 = vadd.xlane.f32.xlu0 %v1027_v57  ;;  %v3064_v27 = vadd.f32 %v2269_v0, %v733_v20  ;;  %v1030_v40 = vmul.f32 %v982_v12, %v982_v12  ;;  %v738_v57 = vpop.permute.xlu1 %737 }
 0x540   :  { %1045 = vadd.xlane.f32.xlu1 %v1028_v2  ;;  %v3062_v13 = vadd.f32 %v920_v3, %v728_v14  ;;  %v1029_v36 = vmul.f32 %v981_v4, %v981_v4 }
 0x541   :  { %v984_v54 = vmul.f32 %v2720_v18, %v3064_v27 }
 0x542   :  { %v2272_v9 = vpop.f32.mrb[10].mxu0  ;;  %v983_v49 = vmul.f32 %v2720_v18, %v3062_v13 }
 0x543   :  { %v930_v15 = vpop.f32.mrb[11].mxu0  ;;  %999 = vadd.xlane.f32.xlu0 %v981_v4  ;;  %v3072_v3 = vadd.f32 %v2272_v9, %v743_v46  ;;  %v748_v52 = vpop.permute.xlu1 %747 }
 0x544   :  { %1001 = vadd.xlane.f32.xlu1 %v982_v12  ;;  %v3070_v2 = vadd.f32 %v930_v15, %v738_v57  ;;  %v1031_v0 = vmul.f32 %v983_v49, %v983_v49  ;;  %v1032_v12 = vmul.f32 %v984_v54, %v984_v54  ;;  %v753_v15 = vpop.permute.xlu0 %752 }
 0x546   :  { %v2275_v39 = vpop.f32.mrb[12].mxu0  ;;  %v985_v20 = vmul.f32 %v2720_v18, %v3070_v2 }
 0x547   :  { %v940_v47 = vpop.f32.mrb[13].mxu0  ;;  %1047 = vadd.xlane.f32.xlu0 %v1029_v36  ;;  %v986_v36 = vmul.f32 %v2720_v18, %v3072_v3  ;;  %v3080_v57 = vadd.f32 %v2275_v39, %v753_v15 }
 0x548   :  { %1049 = vadd.xlane.f32.xlu1 %v1030_v40  ;;  %v1033_v9 = vmul.f32 %v985_v20, %v985_v20  ;;  %v763_v43 = vpop.permute.xlu0 %762 }
 0x54a   :  { %v2278_v44 = vpop.f32.mrb[14].mxu0 }
 0x54b   :  { %v950_v16 = vpop.f32.mrb[15].mxu0  ;;  %1003 = vadd.xlane.f32.xlu0 %v983_v49  ;;  %v3078_v49 = vadd.f32 %v940_v47, %v748_v52  ;;  %v3088_v47 = vadd.f32 %v2278_v44, %v763_v43 }
 0x54c   :  { %1005 = vadd.xlane.f32.xlu1 %v984_v54  ;;  %v1034_v54 = vmul.f32 %v986_v36, %v986_v36 }
 0x54d   :  { %v987_v46 = vmul.f32 %v2720_v18, %v3078_v49 }
 0x54e   :  { %v2281_v4 = vpop.f32.mrb[16].mxu0 }
 0x54f   :  { %v960_v14 = vpop.f32.mrb[17].mxu0  ;;  %1051 = vadd.xlane.f32.xlu0 %v1031_v0  ;;  %v988_v0 = vmul.f32 %v2720_v18, %v3080_v57  ;;  %v1035_v52 = vmul.f32 %v987_v46, %v987_v46 }
 0x550   :  { %1053 = vadd.xlane.f32.xlu1 %v1032_v12  ;;  %v758_v12 = vpop.permute.xlu1 %757 }
 0x551   :  { %v3086_v42 = vadd.f32 %v950_v16, %v758_v12  ;;  %v1036_v39 = vmul.f32 %v988_v0, %v988_v0 }
 0x552   :  { %v2284_v40 = vpop.f32.mrb[18].mxu0 }
 0x553   :  { %v970_v53 = vpop.f32.mrb[19].mxu0  ;;  %1007 = vadd.xlane.f32.xlu0 %v985_v20  ;;  %v989_v20 = vmul.f32 %v2720_v18, %v3086_v42 }
 0x554   :  { %1009 = vadd.xlane.f32.xlu1 %v986_v36  ;;  %v990_v36 = vmul.f32 %v2720_v18, %v3088_v47  ;;  %v768_v15 = vpop.permute.xlu1 %767 }
 0x555   :  { %v1037_v16 = vmul.f32 %v989_v20, %v989_v20 }
 0x556   :  { %v1038_v43 = vmul.f32 %v990_v36, %v990_v36 }
 0x557   :  { %1055 = vadd.xlane.f32.xlu0 %v1033_v9  ;;  %v773_v9 = vpop.permute.xlu0 %772 }
 0x558   :  { %1057 = vadd.xlane.f32.xlu1 %v1034_v54  ;;  %v3094_v54 = vadd.f32 %v960_v14, %v768_v15  ;;  %v3096_v12 = vadd.f32 %v2281_v4, %v773_v9 }
 0x55a   :  { %v991_v44 = vmul.f32 %v2720_v18, %v3094_v54 }
 0x55b   :  { %1011 = vadd.xlane.f32.xlu0 %v987_v46  ;;  %v992_v46 = vmul.f32 %v2720_v18, %v3096_v12 }
 0x55c   :  { %1013 = vadd.xlane.f32.xlu1 %v988_v0  ;;  %v778_v0 = vpop.permute.xlu1 %777  ;;  %v1039_v14 = vmul.f32 %v991_v44, %v991_v44 }
 0x55d   :  { %v1040_v4 = vmul.f32 %v992_v46, %v992_v46 }
 0x55f   :  { %1059 = vadd.xlane.f32.xlu0 %v1035_v52  ;;  %v783_v52 = vpop.permute.xlu0 %782 }
 0x560   :  { %1061 = vadd.xlane.f32.xlu1 %v1036_v39  ;;  %v3102_v39 = vadd.f32 %v970_v53, %v778_v0  ;;  %v3104_v15 = vadd.f32 %v2284_v40, %v783_v52  ;;  %v3113_v53 = vld [vmem:[%s3517_s2] sm:$0xff]  ;;  %v3119_v40 = vld [vmem:[%s3517_s2 + $0x8] sm:$0xff] }
 0x562   :  { %3567 = vst [vmem:[#allocation18_spill] sm:$0xff] %v3104_v15 }
 0x563   :  { %1015 = vadd.xlane.f32.xlu0 %v989_v20  ;;  %v993_v20 = vmul.f32 %v2720_v18, %v3102_v39 }
 0x564   :  { %1017 = vadd.xlane.f32.xlu1 %v990_v36  ;;  %v994_v36 = vmul.f32 %v2720_v18, %v3104_v15 }
 0x565   :  { %v1041_v9 = vmul.f32 %v993_v20, %v993_v20 }
 0x567   :  { %1063 = vadd.xlane.f32.xlu0 %v1037_v16  ;;  %v1042_v16 = vmul.f32 %v994_v36, %v994_v36 }
 0x568   :  { %1065 = vadd.xlane.f32.xlu1 %v1038_v43  ;;  %v3126_v43 = vld [vmem:[%s3517_s2 + $0x10] sm:$0xff] }
 0x56b   :  { %1019 = vadd.xlane.f32.xlu0 %v991_v44  ;;  %v3133_v44 = vld [vmem:[%s3517_s2 + $0x18] sm:$0xff] }
 0x56c   :  { %1021 = vadd.xlane.f32.xlu1 %v992_v46 }
 0x56f   :  { %1067 = vadd.xlane.f32.xlu0 %v1039_v14 }
 0x570   :  { %1069 = vadd.xlane.f32.xlu1 %v1040_v4 }
 0x573   :  { %1023 = vadd.xlane.f32.xlu0 %v993_v20 }
 0x574   :  { %1025 = vadd.xlane.f32.xlu1 %v994_v36 }
 0x577   :  { %1071 = vadd.xlane.f32.xlu0 %v1041_v9 }
 0x578   :  { %1073 = vadd.xlane.f32.xlu1 %v1042_v16 }
 0x589   :  { %1316 = vperm.xlu1 %2486, %v3113_v53  }
 0x58d   :  { %1320 = vperm.xlu1 %2486, %v3119_v40   ;;  %1336 = vperm.xlu0 %2487, %v2768_v24   ;;  %v3532_v24 = vmov 7  }
 0x591   :  { %1324 = vperm.xlu1 %2486, %v3126_v43   ;;  %1340 = vperm.xlu0 %2487, %v2788_v28  }
 0x595   :  { %1328 = vperm.xlu1 %2486, %v3133_v44   ;;  %1352 = vperm.xlu0 %2487, %v2928_v59  }
 0x599   :  { %1332 = vperm.xlu1 %2486, %v2782_v26   ;;  %1356 = vperm.xlu0 %2487, %v2945_v8  }
 0x59d   :  { %1344 = vperm.xlu1 %2486, %v2775_v25   ;;  %2489 = vset.pattern.permute.xlu0 %v3532_v24 }
 0x5a1   :  { %1348 = vperm.xlu1 %2486, %v2933_v5  }
 0x5a5   :  { %1360 = vperm.xlu1 %2486, %v2940_v6  }
 0x5a9   :  { %1364 = vperm.xlu1 %2486, %v2957_v32  }
 0x5ad   :  { %2488 = vset.pattern.permute.xlu1 %v3532_v24 }
 0x5c8   :  { %v998_v28 = vpop.xlane.xlu0 %997 }
 0x5c9   :  { %v996_v46 = vpop.xlane.xlu1 %995  ;;  %v3145_v0 = vmul.f32 0.125, %v998_v28 }
 0x5ca   :  { %v3147_v26 = vmul.f32 0.125, %v996_v46 }
 0x5cb   :  { %v1108_v20 = vmul.f32 %v3145_v0, %v3145_v0 }
 0x5cc   :  { %v1107_v25 = vmul.f32 %v3147_v26, %v3147_v26  ;;  %v1044_v52 = vpop.xlane.xlu0 %1043 }
 0x5cd   :  { %v1091_v14 = vmul.f32 0.125, %v1044_v52  ;;  %v1046_v4 = vpop.xlane.xlu1 %1045 }
 0x5ce   :  { %v1092_v36 = vmul.f32 0.125, %v1046_v4 }
 0x5cf   :  { %v1123_v9 = vsub.f32 %v1091_v14, %v1107_v25 }
 0x5d0   :  { %v1124_v16 = vsub.f32 %v1092_v36, %v1108_v20  ;;  %v1000_v17 = vpop.xlane.xlu0 %999 }
 0x5d1   :  { %v1139_v63 = vmax.f32 %v1123_v9, 0.0  ;;  %v3153_v1 = vmul.f32 0.125, %v1000_v17  ;;  %v1002_v28 = vpop.xlane.xlu1 %1001 }
 0x5d2   :  { %v1140_v37 = vmax.f32 %v1124_v16, 0.0  ;;  %v3155_v46 = vmul.f32 0.125, %v1002_v28 }
 0x5d3   :  { %v1155_v21 = vadd.f32 1e-05, %v1139_v63  ;;  %v1109_v52 = vmul.f32 %v3153_v1, %v3153_v1 }
 0x5d4   :  { %v1156_v29 = vadd.f32 1e-05, %v1140_v37  ;;  %v1048_v23 = vpop.xlane.xlu0 %1047  ;;  %v1110_v25 = vmul.f32 %v3155_v46, %v3155_v46 }
 0x5d5   :  { %2539 = vrsqrt.f32 %v1155_v21  ;;  %v1093_v61 = vmul.f32 0.125, %v1048_v23  ;;  %v1050_v60 = vpop.xlane.xlu1 %1049 }
 0x5d6   :  { %2541 = vrsqrt.f32 %v1156_v29  ;;  %v1094_v14 = vmul.f32 0.125, %v1050_v60 }
 0x5d7   :  { %v1125_v17 = vsub.f32 %v1093_v61, %v1109_v52 }
 0x5d8   :  { %v1126_v4 = vsub.f32 %v1094_v14, %v1110_v25  ;;  %v1004_v20 = vpop.xlane.xlu0 %1003 }
 0x5d9   :  { %v1141_v36 = vmax.f32 %v1125_v17, 0.0  ;;  %v3161_v9 = vmul.f32 0.125, %v1004_v20  ;;  %v1006_v63 = vpop.xlane.xlu1 %1005 }
 0x5da   :  { %v1142_v37 = vmax.f32 %v1126_v4, 0.0  ;;  %v3163_v16 = vmul.f32 0.125, %v1006_v63 }
 0x5db   :  { %v1157_v21 = vadd.f32 1e-05, %v1141_v36  ;;  %v1111_v23 = vmul.f32 %v3161_v9, %v3161_v9 }
 0x5dc   :  { %v1158_v28 = vadd.f32 1e-05, %v1142_v37  ;;  %v1052_v24 = vpop.xlane.xlu0 %1051  ;;  %v1112_v60 = vmul.f32 %v3163_v16, %v3163_v16 }
 0x5dd   :  { %v1095_v29 = vmul.f32 0.125, %v1052_v24  ;;  %v1054_v34 = vpop.xlane.xlu1 %1053 }
 0x5de   :  { %2543 = vrsqrt.f32 %v1158_v28  ;;  %v1096_v61 = vmul.f32 0.125, %v1054_v34 }
 0x5df   :  { %v2540_v52 = vpop.eup %2539  ;;  %v1127_v25 = vsub.f32 %v1095_v29, %v1111_v23  ;;  %2545 = vrsqrt.f32 %v1157_v21 }
 0x5e0   :  { %v2542_v14 = vpop.eup %2541  ;;  %v1128_v17 = vsub.f32 %v1096_v61, %v1112_v60  ;;  %v1008_v4 = vpop.xlane.xlu0 %1007  ;;  %v1187_v20 = vmul.f32 %v3113_v53, %v2540_v52 }
 0x5e1   :  { %v1143_v36 = vmax.f32 %v1127_v25, 0.0  ;;  %v3170_v63 = vmul.f32 0.125, %v1008_v4  ;;  %v1010_v37 = vpop.xlane.xlu1 %1009  ;;  %v1188_v24 = vmul.f32 %v3119_v40, %v2542_v14 }
 0x5e2   :  { %v1144_v51 = vmax.f32 %v1128_v17, 0.0  ;;  %v3173_v28 = vmul.f32 0.125, %v1010_v37  ;;  %1221 = vperm.xlu0 %2489, %v1187_v20  }
 0x5e3   :  { %v1159_v48 = vadd.f32 1e-05, %v1143_v36  ;;  %1226 = vperm.xlu1 %2488, %v1188_v24   ;;  %v1113_v21 = vmul.f32 %v3170_v63, %v3170_v63 }
 0x5e4   :  { %v1160_v34 = vadd.f32 1e-05, %v1144_v51  ;;  %v1056_v23 = vpop.xlane.xlu0 %1055  ;;  %v1114_v61 = vmul.f32 %v3173_v28, %v3173_v28 }
 0x5e5   :  { %2547 = vrsqrt.f32 %v1159_v48  ;;  %v1097_v29 = vmul.f32 0.125, %v1056_v23  ;;  %v1058_v60 = vpop.xlane.xlu1 %1057 }
 0x5e6   :  { %2549 = vrsqrt.f32 %v1160_v34  ;;  %v1098_v52 = vmul.f32 0.125, %v1058_v60 }
 0x5e7   :  { %v1129_v25 = vsub.f32 %v1097_v29, %v1113_v21 }
 0x5e8   :  { %v2544_v14 = vpop.eup %2543  ;;  %v1130_v17 = vsub.f32 %v1098_v52, %v1114_v61  ;;  %v1012_v4 = vpop.xlane.xlu0 %1011 }
 0x5e9   :  { %v1145_v20 = vmax.f32 %v1129_v25, 0.0  ;;  %v3179_v36 = vmul.f32 0.125, %v1012_v4  ;;  %v1014_v51 = vpop.xlane.xlu1 %1013  ;;  %v1190_v48 = vmul.f32 %v3133_v44, %v2544_v14  ;;  %v2546_v37 = vpop.eup %2545 }
 0x5ea   :  { %v1146_v24 = vmax.f32 %v1130_v17, 0.0  ;;  %v3182_v38 = vmul.f32 0.125, %v1014_v51  ;;  %v1189_v61 = vmul.f32 %v3126_v43, %v2546_v37 }
 0x5eb   :  { %1236 = vperm.xlu1 %2488, %v1190_v48   ;;  %v1161_v34 = vadd.f32 1e-05, %v1145_v20  ;;  %v1115_v21 = vmul.f32 %v3179_v36, %v3179_v36  ;;  %v3192_v48 = vld [vmem:[%s3517_s2 + $0x20] sm:$0xff] }
 0x5ec   :  { %v1162_v23 = vadd.f32 1e-05, %v1146_v24  ;;  %v1060_v41 = vpop.xlane.xlu0 %1059  ;;  %v1116_v52 = vmul.f32 %v3182_v38, %v3182_v38 }
 0x5ed   :  { %v1099_v29 = vmul.f32 0.125, %v1060_v41  ;;  %v1062_v60 = vpop.xlane.xlu1 %1061 }
 0x5ee   :  { %2551 = vrsqrt.f32 %v1162_v23  ;;  %v1100_v25 = vmul.f32 0.125, %v1062_v60 }
 0x5ef   :  { %v2548_v14 = vpop.eup %2547  ;;  %v1131_v17 = vsub.f32 %v1099_v29, %v1115_v21  ;;  %1231 = vperm.xlu1 %2488, %v1189_v61   ;;  %2553 = vrsqrt.f32 %v1161_v34  ;;  %v3200_v21 = vld [vmem:[%s3517_s2 + $0x28] sm:$0xff] }
 0x5f0   :  { %v2550_v4 = vpop.eup %2549  ;;  %v1132_v20 = vsub.f32 %v1100_v25, %v1116_v52  ;;  %v1016_v51 = vpop.xlane.xlu0 %1015  ;;  %v1191_v41 = vmul.f32 %v3192_v48, %v2548_v14 }
 0x5f1   :  { %v1147_v37 = vmax.f32 %v1131_v17, 0.0  ;;  %v3195_v24 = vmul.f32 0.125, %v1016_v51  ;;  %v1018_v23 = vpop.xlane.xlu1 %1017  ;;  %v1192_v34 = vmul.f32 %v3200_v21, %v2550_v4 }
 0x5f2   :  { %v1148_v29 = vmax.f32 %v1132_v20, 0.0  ;;  %v3203_v60 = vmul.f32 0.125, %v1018_v23 }
 0x5f3   :  { %v1163_v61 = vadd.f32 1e-05, %v1147_v37  ;;  %1246 = vperm.xlu0 %2489, %v1192_v34   ;;  %1241 = vperm.xlu1 %2488, %v1191_v41   ;;  %v1117_v14 = vmul.f32 %v3195_v24, %v3195_v24 }
 0x5f4   :  { %v1164_v52 = vadd.f32 1e-05, %v1148_v29  ;;  %v1064_v25 = vpop.xlane.xlu0 %1063  ;;  %v1118_v62 = vmul.f32 %v3203_v60, %v3203_v60  ;;  %v3214_v29 = vld [vmem:[%s3517_s2 + $0x38] sm:$0xff] }
 0x5f5   :  { %2555 = vrsqrt.f32 %v1163_v61  ;;  %v1101_v17 = vmul.f32 0.125, %v1064_v25  ;;  %v1066_v51 = vpop.xlane.xlu1 %1065  ;;  %3568 = vst [vmem:[#allocation19_spill] sm:$0xff] %v3214_v29 }
 0x5f6   :  { %2557 = vrsqrt.f32 %v1164_v52  ;;  %v1102_v50 = vmul.f32 0.125, %v1066_v51 }
 0x5f7   :  { %v1133_v4 = vsub.f32 %v1101_v17, %v1117_v14 }
 0x5f8   :  { %v2552_v20 = vpop.eup %2551  ;;  %v1134_v23 = vsub.f32 %v1102_v50, %v1118_v62  ;;  %v1020_v35 = vpop.xlane.xlu0 %1019 }
 0x5f9   :  { %v1149_v37 = vmax.f32 %v1133_v4, 0.0  ;;  %v3209_v34 = vmul.f32 0.125, %v1020_v35  ;;  %v1022_v41 = vpop.xlane.xlu1 %1021  ;;  %v1194_v61 = vmul.f32 %v3214_v29, %v2552_v20  ;;  %v2554_v52 = vpop.eup %2553  ;;  %v3224_v4 = vld [vmem:[%s3517_s2 + $0x30] sm:$0xff] }
 0x5fa   :  { %v1150_v25 = vmax.f32 %v1134_v23, 0.0  ;;  %v3217_v11 = vmul.f32 0.125, %v1022_v41  ;;  %3569 = vst [vmem:[#allocation20_spill] sm:$0xff] %v3224_v4  ;;  %v1193_v20 = vmul.f32 %v3224_v4, %v2554_v52 }
 0x5fb   :  { %1256 = vperm.xlu1 %2488, %v1194_v61   ;;  %v1165_v14 = vadd.f32 1e-05, %v1149_v37  ;;  %v1119_v35 = vmul.f32 %v3209_v34, %v3209_v34 }
 0x5fc   :  { %v1166_v17 = vadd.f32 1e-05, %v1150_v25  ;;  %v1068_v50 = vpop.xlane.xlu0 %1067  ;;  %v1120_v23 = vmul.f32 %v3217_v11, %v3217_v11 }
 0x5fd   :  { %v1103_v62 = vmul.f32 0.125, %v1068_v50  ;;  %v1070_v51 = vpop.xlane.xlu1 %1069 }
 0x5fe   :  { %2559 = vrsqrt.f32 %v1166_v17  ;;  %v1104_v41 = vmul.f32 0.125, %v1070_v51 }
 0x5ff   :  { %v2556_v37 = vpop.eup %2555  ;;  %v1135_v61 = vsub.f32 %v1103_v62, %v1119_v35  ;;  %1251 = vperm.xlu1 %2488, %v1193_v20   ;;  %2561 = vrsqrt.f32 %v1165_v14 }
 0x600   :  { %v2558_v25 = vpop.eup %2557  ;;  %v1136_v22 = vsub.f32 %v1104_v41, %v1120_v23  ;;  %v1024_v50 = vpop.xlane.xlu0 %1023  ;;  %v1195_v7 = vmul.f32 %v2556_v37, %v2933_v5 }
 0x601   :  { %v1151_v56 = vmax.f32 %v1135_v61, 0.0  ;;  %v3230_v55 = vmul.f32 0.125, %v1024_v50  ;;  %v1026_v18 = vpop.xlane.xlu1 %1025  ;;  %v1196_v52 = vmul.f32 %v2558_v25, %v2928_v59  ;;  %v3570_v59 = vmov 8  }
 0x602   :  { %v1152_v17 = vmax.f32 %v1136_v22, 0.0  ;;  %v3233_v15 = vmul.f32 0.125, %v1026_v18  ;;  %1261 = vperm.xlu0 %2489, %v1195_v7   ;;  %v3571_v50 = vmov 7  }
 0x603   :  { %v1167_v51 = vadd.f32 1e-05, %v1151_v56  ;;  %1266 = vperm.xlu1 %2488, %v1196_v52   ;;  %v1121_v14 = vmul.f32 %v3230_v55, %v3230_v55 }
 0x604   :  { %v1168_v35 = vadd.f32 1e-05, %v1152_v17  ;;  %v1072_v62 = vpop.xlane.xlu0 %1071  ;;  %v1122_v23 = vmul.f32 %v3233_v15, %v3233_v15 }
 0x605   :  { %2563 = vrsqrt.f32 %v1167_v51  ;;  %v1105_v20 = vmul.f32 0.125, %v1072_v62  ;;  %v1074_v5 = vpop.xlane.xlu1 %1073 }
 0x606   :  { %2565 = vrsqrt.f32 %v1168_v35  ;;  %v1106_v41 = vmul.f32 0.125, %v1074_v5  ;;  %2490 = vset.pattern.permute.xlu0 %v3570_v59 }
 0x607   :  { %v1137_v18 = vsub.f32 %v1105_v20, %v1121_v14  ;;  %1368 = vperm.xlu0 %2490, %v2952_v10  }
 0x608   :  { %v2560_v56 = vpop.eup %2559  ;;  %v1138_v7 = vsub.f32 %v1106_v41, %v1122_v23 }
 0x609   :  { %v1153_v22 = vmax.f32 %v1137_v18, 0.0  ;;  %v1198_v37 = vmul.f32 %v2560_v56, %v2940_v6  ;;  %v2562_v61 = vpop.eup %2561  ;;  %v2644_v56 = vmov 9  }
 0x60a   :  { %v1154_v25 = vmax.f32 %v1138_v7, 0.0  ;;  %v1197_v51 = vmul.f32 %v2562_v61, %v2945_v8 }
 0x60b   :  { %1276 = vperm.xlu1 %2488, %v1198_v37   ;;  %2491 = vset.pattern.permute.xlu0 %v3571_v50  ;;  %v1169_v52 = vadd.f32 1e-05, %v1153_v22 }
 0x60c   :  { %v1170_v17 = vadd.f32 1e-05, %v1154_v25 }
 0x60e   :  { %2567 = vrsqrt.f32 %v1170_v17  ;;  %v1203_v17 = vsub.f32 %v3048_v45, %v3147_v26  ;;  %v1205_v45 = vsub.f32 %v3054_v30, %v3153_v1 }
 0x60f   :  { %v2564_v35 = vpop.eup %2563  ;;  %1271 = vperm.xlu1 %2488, %v1197_v51   ;;  %2569 = vrsqrt.f32 %v1169_v52  ;;  %v1204_v51 = vsub.f32 %v3046_v19, %v3145_v0 }
 0x610   :  { %v2566_v62 = vpop.eup %2565  ;;  %v1199_v14 = vmul.f32 %v2564_v35, %v2957_v32  ;;  %v1412_v32 = vld [vmem:[#allocation2 + $0x180] sm:$0xff] }
 0x611   :  { %v1200_v20 = vmul.f32 %v2566_v62, %v2952_v10  ;;  %2317 = vmatprep.mubr.f32.mxu1 %v1412_v32  ;;  %v1317_v10 = vpop.permute.xlu1 %1316  ;;  %v1206_v32 = vsub.f32 %v3056_v58, %v3155_v46 }
 0x612   :  { %1281 = vperm.xlu0 %2491, %v1199_v14  }
 0x613   :  { %1286 = vperm.xlu1 %2488, %v1200_v20  }
 0x615   :  { %v1321_v41 = vpop.permute.xlu1 %1320 }
 0x616   :  { %2492 = vset.pattern.permute.xlu0 %v3570_v59 }
 0x617   :  { %1372 = vperm.xlu0 %2492, %v2969_v33  }
 0x618   :  { %v2568_v6 = vpop.eup %2567 }
 0x619   :  { %v1202_v5 = vmul.f32 %v2568_v6, %v2964_v31  ;;  %v2570_v23 = vpop.eup %2569  ;;  %v1325_v18 = vpop.permute.xlu1 %1324 }
 0x61a   :  { %v1201_v8 = vmul.f32 %v2570_v23, %v2969_v33  ;;  %v1337_v33 = vpop.permute.xlu0 %1336 }
 0x61b   :  { %1296 = vperm.xlu1 %2488, %v1202_v5   ;;  %2494 = vset.pattern.permute.xlu0 %v2644_v56 }
 0x61c   :  { %1421 = vperm.xlu0 %2494, %v3113_v53  }
 0x61d   :  { %v1329_v7 = vpop.permute.xlu1 %1328 }
 0x61e   :  { %v1341_v22 = vpop.permute.xlu0 %1340 }
 0x61f   :  { %1291 = vperm.xlu1 %2488, %v1201_v8  }
 0x620   :  { %1433 = vperm.xlu0 %2494, %v3133_v44  }
 0x622   :  { %v1353_v61 = vpop.permute.xlu0 %1352 }
 0x623   :  { %2493 = vset.pattern.permute.xlu1 %v3570_v59 }
 0x624   :  { %1376 = vperm.xlu1 %2493, %v2964_v31   ;;  %1441 = vperm.xlu0 %2494, %v3200_v21   ;;  %v1333_v31 = vpop.permute.xlu1 %1332 }
 0x626   :  { %v3262_v50 = vpop.permute.xlu0 %1356 }
 0x628   :  { %2495 = vset.pattern.permute.xlu1 %v2644_v56  ;;  %1449 = vperm.xlu0 %2494, %v3214_v29   ;;  %v1345_v59 = vpop.permute.xlu1 %1344 }
 0x629   :  { %1425 = vperm.xlu1 %2495, %v3119_v40  }
 0x62c   :  { %v1349_v37 = vpop.permute.xlu1 %1348 }
 0x62d   :  { %1429 = vperm.xlu1 %2495, %v3126_v43  }
 0x630   :  { %v3260_v25 = vpop.permute.xlu1 %1360 }
 0x631   :  { %1437 = vperm.xlu1 %2495, %v3192_v48  }
 0x634   :  { %v3264_v52 = vpop.permute.xlu1 %1364 }
 0x635   :  { %1445 = vperm.xlu1 %2495, %v3224_v4  }
 0x661   :  { %v1222_v35 = vpop.permute.xlu0 %1221 }
 0x662   :  { %v1299_v62 = vmul.f32 %v1222_v35, %v1203_v17  ;;  %v1227_v14 = vpop.permute.xlu1 %1226 }
 0x663   :  { %v1300_v20 = vmul.f32 %v1227_v14, %v1204_v51 }
 0x664   :  { %v1379_v6 = vadd.f32 %v1317_v10, %v1299_v62  ;;  %v1207_v10 = vsub.f32 %v3062_v13, %v3161_v9 }
 0x665   :  { %v1380_v5 = vadd.f32 %v1321_v41, %v1300_v20  ;;  %v1208_v41 = vsub.f32 %v3064_v27, %v3163_v16  ;;  %v1209_v27 = vsub.f32 %v3070_v2, %v3170_v63 }
 0x666   :  { %v1395_v23 = vmax.f32 %v1379_v6, 0.0 }
 0x667   :  { %v1396_v8 = vmax.f32 %v1380_v5, 0.0 }
 0x669   :  { %v2390_v56 = vpack.c.bf16 %v1396_v8, %v1395_v23  ;;  %v1212_v8 = vsub.f32 %v3080_v57, %v3182_v38  ;;  %v1213_v57 = vsub.f32 %v3086_v42, %v3195_v24 }
 0x66a   :  { %v1237_v4 = vpop.permute.xlu1 %1236 }
 0x66b   :  { %v1302_v29 = vmul.f32 %v1237_v4, %v1206_v32  ;;  %2391 = vmatprep.subr.bf16.mxu1 %v2390_v56 }
 0x66c   :  { %2393 = vmatpush3.bf16.msra.mxu1 %v2390_v56 }
 0x66d   :  { %v1382_v0 = vadd.f32 %v1329_v7, %v1302_v29  ;;  %v1210_v29 = vsub.f32 %v3072_v3, %v3173_v28 }
 0x66e   :  { %v1232_v19 = vpop.permute.xlu1 %1231 }
 0x66f   :  { %v1301_v26 = vmul.f32 %v1232_v19, %v1205_v45  ;;  %v1398_v46 = vmax.f32 %v1382_v0, 0.0 }
 0x671   :  { %v1381_v17 = vadd.f32 %v1325_v18, %v1301_v26 }
 0x672   :  { %v1242_v51 = vpop.permute.xlu1 %1241  ;;  %v1247_v58 = vpop.permute.xlu0 %1246 }
 0x673   :  { %v1397_v35 = vmax.f32 %v1381_v17, 0.0  ;;  %v1303_v4 = vmul.f32 %v1242_v51, %v1207_v10  ;;  %v1304_v62 = vmul.f32 %v1247_v58, %v1208_v41  ;;  %v1215_v10 = vsub.f32 %v3094_v54, %v3209_v34 }
 0x675   :  { %v1383_v14 = vadd.f32 %v1333_v31, %v1303_v4  ;;  %v1384_v20 = vadd.f32 %v1337_v33, %v1304_v62  ;;  %v2394_v6 = vpack.c.bf16 %v1398_v46, %v1397_v35  ;;  %v1211_v33 = vsub.f32 %v3078_v49, %v3179_v36 }
 0x676   :  { %v1214_v49 = vsub.f32 %v3088_v47, %v3203_v60  ;;  %v1216_v47 = vsub.f32 %v3096_v12, %v3217_v11  ;;  %v1217_v11 = vsub.f32 %v3102_v39, %v3230_v55  ;;  %v1415_v55 = vld [vmem:[#allocation2 + $0x198] sm:$0xff]  ;;  %v1416_v39 = vld [vmem:[#allocation2 + $0x1a0] sm:$0xff] }
 0x677   :  { %v1399_v1 = vmax.f32 %v1383_v14, 0.0  ;;  %v1400_v30 = vmax.f32 %v1384_v20, 0.0  ;;  %2395 = vmatprep.subr.bf16.mxu1 %v2394_v6 }
 0x678   :  { %2397 = vmatpush3.bf16.msra.mxu1 %v2394_v6  ;;  %v3572_v6 = vld [vmem:[#allocation18_spill] sm:$0xff] }
 0x679   :  { %v2398_v13 = vpack.c.bf16 %v1400_v30, %v1399_v1  ;;  %v1218_v1 = vsub.f32 %v3572_v6, %v3233_v15  ;;  %v1419_v15 = vld [vmem:[#allocation2 + $0x1b8] sm:$0xff]  ;;  %v2646_v6 = vmov 10  }
 0x67a   :  { %v1257_v9 = vpop.permute.xlu1 %1256  ;;  %2498 = vset.pattern.permute.xlu0 %v2646_v6 }
 0x67b   :  { %v1306_v18 = vmul.f32 %v1257_v9, %v1210_v29  ;;  %2399 = vmatprep.subr.bf16.mxu1 %v2398_v13 }
 0x67c   :  { %2401 = vmatpush3.bf16.msra.mxu1 %v2398_v13 }
 0x67d   :  { %v1386_v7 = vadd.f32 %v1345_v59, %v1306_v18 }
 0x67e   :  { %v1252_v16 = vpop.permute.xlu1 %1251 }
 0x67f   :  { %v1305_v31 = vmul.f32 %v1252_v16, %v1209_v27  ;;  %v1402_v32 = vmax.f32 %v1386_v7, 0.0  ;;  %v1413_v16 = vld [vmem:[#allocation2 + $0x188] sm:$0xff]  ;;  %v1414_v7 = vld [vmem:[#allocation2 + $0x190] sm:$0xff] }
 0x681   :  { %v1385_v5 = vadd.f32 %v1341_v22, %v1305_v31  ;;  %v1262_v23 = vpop.permute.xlu0 %1261  ;;  %v1417_v31 = vld [vmem:[#allocation2 + $0x1a8] sm:$0xff] }
 0x682   :  { %v1307_v3 = vmul.f32 %v1262_v23, %v1211_v33  ;;  %v1267_v28 = vpop.permute.xlu1 %1266  ;;  %v1418_v33 = vld [vmem:[#allocation2 + $0x1b0] sm:$0xff] }
 0x683   :  { %v1401_v56 = vmax.f32 %v1385_v5, 0.0  ;;  %v1308_v45 = vmul.f32 %v1267_v28, %v1212_v8  ;;  %v2645_v5 = vmov 11  }
 0x684   :  { %v1387_v19 = vadd.f32 %v1349_v37, %v1307_v3  ;;  %2496 = vset.pattern.permute.xlu1 %v2645_v5 }
 0x685   :  { %v1388_v0 = vadd.f32 %v1353_v61, %v1308_v45  ;;  %v2402_v26 = vpack.c.bf16 %v1402_v32, %v1401_v56  ;;  %v3573_v45 = vld [vmem:[#allocation5_spill] sm:$0xff] }
 0x686   :  { %v1403_v2 = vmax.f32 %v1387_v19, 0.0  ;;  %v1369_v38 = vpop.permute.xlu0 %1368 }
 0x687   :  { %v1404_v63 = vmax.f32 %v1388_v0, 0.0  ;;  %2403 = vmatprep.subr.bf16.mxu1 %v2402_v26 }
 0x688   :  { %2405 = vmatpush3.bf16.msra.mxu1 %v2402_v26 }
 0x689   :  { %v2406_v36 = vpack.c.bf16 %v1404_v63, %v1403_v2 }
 0x68a   :  { %v1277_v59 = vpop.permute.xlu1 %1276 }
 0x68b   :  { %v1310_v22 = vmul.f32 %v1277_v59, %v1214_v49  ;;  %2407 = vmatprep.subr.bf16.mxu1 %v2406_v36 }
 0x68c   :  { %2409 = vmatpush3.bf16.msra.mxu1 %v2406_v36 }
 0x68d   :  { %v1390_v37 = vadd.f32 %v3260_v25, %v1310_v22 }
 0x68e   :  { %v1272_v17 = vpop.permute.xlu1 %1271 }
 0x68f   :  { %v1309_v61 = vmul.f32 %v1272_v17, %v1213_v57  ;;  %v1406_v46 = vmax.f32 %v1390_v37, 0.0 }
 0x691   :  { %v1389_v41 = vadd.f32 %v3262_v50, %v1309_v61  ;;  %v1282_v51 = vpop.permute.xlu0 %1281 }
 0x692   :  { %v1311_v60 = vmul.f32 %v1282_v51, %v1215_v10  ;;  %v1287_v58 = vpop.permute.xlu1 %1286 }
 0x693   :  { %v1405_v35 = vmax.f32 %v1389_v41, 0.0  ;;  %v1312_v4 = vmul.f32 %v1287_v58, %v1216_v47 }
 0x694   :  { %v1391_v42 = vadd.f32 %v3264_v52, %v1311_v60 }
 0x695   :  { %v1392_v24 = vadd.f32 %v1369_v38, %v1312_v4  ;;  %v2410_v62 = vpack.c.bf16 %v1406_v46, %v1405_v35 }
 0x696   :  { %v1407_v25 = vmax.f32 %v1391_v42, 0.0  ;;  %v1373_v20 = vpop.permute.xlu0 %1372 }
 0x697   :  { %v1408_v14 = vmax.f32 %v1392_v24, 0.0  ;;  %2411 = vmatprep.subr.bf16.mxu1 %v2410_v62 }
 0x698   :  { %2413 = vmatpush3.bf16.msra.mxu1 %v2410_v62 }
 0x699   :  { %v2414_v54 = vpack.c.bf16 %v1408_v14, %v1407_v25 }
 0x69a   :  { %v1297_v34 = vpop.permute.xlu1 %1296 }
 0x69b   :  { %2415 = vmatprep.subr.bf16.mxu1 %v2414_v54  ;;  %v1314_v52 = vmul.f32 %v1297_v34, %v1218_v1  ;;  %v1422_v3 = vpop.permute.xlu0 %1421 }
 0x69c   :  { %2417 = vmatpush3.bf16.msra.mxu1 %v2414_v54 }
 0x69e   :  { %v1292_v12 = vpop.permute.xlu1 %1291 }
 0x69f   :  { %v1313_v50 = vmul.f32 %v1292_v12, %v1217_v11  ;;  %v1434_v36 = vpop.permute.xlu0 %1433 }
 0x6a1   :  { %v1393_v30 = vadd.f32 %v1373_v20, %v1313_v50 }
 0x6a3   :  { %v1377_v29 = vpop.permute.xlu1 %1376  ;;  %v1409_v9 = vmax.f32 %v1393_v30, 0.0  ;;  %v1442_v47 = vpop.permute.xlu0 %1441 }
 0x6a4   :  { %v1394_v13 = vadd.f32 %v1377_v29, %v1314_v52 }
 0x6a6   :  { %v1410_v18 = vmax.f32 %v1394_v13, 0.0 }
 0x6a7   :  { %v1450_v62 = vpop.permute.xlu0 %1449 }
 0x6a8   :  { %v2418_v27 = vpack.c.bf16 %v1410_v18, %v1409_v9  ;;  %v1426_v23 = vpop.permute.xlu1 %1425 }
 0x6aa   :  { %2419 = vmatprep.subr.bf16.mxu1 %v2418_v27 }
 0x6ab   :  { %2421 = vmatpush3.bf16.msra.mxu1 %v2418_v27 }
 0x6ac   :  { %v1430_v63 = vpop.permute.xlu1 %1429 }
 0x6ae   :  { %2318 = vmatmul.mubr.f32.vlgmr.msra.gmra.mrb[8].mxu1 %v1413_v16 }
 0x6af   :  { %2320 = vmatprep.mubr.f32.mxu1 %v1414_v7 }
 0x6b0   :  { %v1438_v51 = vpop.permute.xlu1 %1437 }
 0x6b2   :  { %2321 = vmatmul.mubr.f32.gmra.mrb[10].mxu1 %v1415_v55 }
 0x6b3   :  { %2323 = vmatprep.mubr.f32.mxu1 %v1416_v39 }
 0x6b4   :  { %v1446_v24 = vpop.permute.xlu1 %1445 }
 0x6b6   :  { %2324 = vmatmul.mubr.f32.gmra.mrb[12].mxu1 %v1417_v31 }
 0x6b7   :  { %2326 = vmatprep.mubr.f32.mxu1 %v1418_v33 }
 0x6ba   :  { %2327 = vmatmul.mubr.f32.gmra.mrb[14].mxu1 %v1419_v15 }
 0x781   :  { %v2319_v8 = vpop.f32.mrb[8].mxu1 }
 0x782   :  { %v3302_v28 = vadd.f32 %v2319_v8, %v1426_v23  ;;  %v1518_v32 = vpop.f32.mrb[9].mxu1 }
 0x783   :  { %v3304_v56 = vadd.f32 %v1518_v32, %v1422_v3 }
 0x784   :  { %v1558_v19 = vmul.f32 %v3573_v45, %v3302_v28 }
 0x785   :  { %v1557_v0 = vmul.f32 %v3573_v45, %v3304_v56  ;;  %v2322_v26 = vpop.f32.mrb[10].mxu1 }
 0x786   :  { %1567 = vadd.xlane.f32.xlu0 %v1558_v19  ;;  %v1528_v2 = vpop.f32.mrb[11].mxu1  ;;  %v3312_v22 = vadd.f32 %v2322_v26, %v1434_v36  ;;  %v1582_v57 = vmul.f32 %v1558_v19, %v1558_v19 }
 0x787   :  { %1565 = vadd.xlane.f32.xlu1 %v1557_v0  ;;  %v1581_v49 = vmul.f32 %v1557_v0, %v1557_v0  ;;  %v3310_v59 = vadd.f32 %v1528_v2, %v1430_v63 }
 0x788   :  { %v1560_v61 = vmul.f32 %v3573_v45, %v3312_v22 }
 0x789   :  { %v2325_v38 = vpop.f32.mrb[12].mxu1  ;;  %v1559_v37 = vmul.f32 %v3573_v45, %v3310_v59 }
 0x78a   :  { %v1538_v17 = vpop.f32.mrb[13].mxu1  ;;  %1589 = vadd.xlane.f32.xlu0 %v1581_v49  ;;  %v3320_v46 = vadd.f32 %v2325_v38, %v1442_v47  ;;  %v1584_v35 = vmul.f32 %v1560_v61, %v1560_v61 }
 0x78b   :  { %1591 = vadd.xlane.f32.xlu1 %v1582_v57  ;;  %v3318_v60 = vadd.f32 %v1538_v17, %v1438_v51  ;;  %v1583_v58 = vmul.f32 %v1559_v37, %v1559_v37 }
 0x78c   :  { %v1562_v42 = vmul.f32 %v3573_v45, %v3320_v46 }
 0x78d   :  { %v2328_v10 = vpop.f32.mrb[14].mxu1  ;;  %v1561_v4 = vmul.f32 %v3573_v45, %v3318_v60 }
 0x78e   :  { %v1548_v41 = vpop.f32.mrb[15].mxu1  ;;  %1569 = vadd.xlane.f32.xlu0 %v1559_v37  ;;  %v3328_v54 = vadd.f32 %v2328_v10, %v1450_v62  ;;  %v1586_v34 = vmul.f32 %v1562_v42, %v1562_v42 }
 0x78f   :  { %1571 = vadd.xlane.f32.xlu1 %v1560_v61  ;;  %v3326_v25 = vadd.f32 %v1548_v41, %v1446_v24  ;;  %v1585_v14 = vmul.f32 %v1561_v4, %v1561_v4 }
 0x790   :  { %v1564_v12 = vmul.f32 %v3573_v45, %v3328_v54 }
 0x791   :  { %v1563_v11 = vmul.f32 %v3573_v45, %v3326_v25 }
 0x792   :  { %1593 = vadd.xlane.f32.xlu0 %v1583_v58  ;;  %v1588_v20 = vmul.f32 %v1564_v12, %v1564_v12 }
 0x793   :  { %1595 = vadd.xlane.f32.xlu1 %v1584_v35  ;;  %v1587_v50 = vmul.f32 %v1563_v11, %v1563_v11 }
 0x796   :  { %1573 = vadd.xlane.f32.xlu0 %v1561_v4 }
 0x797   :  { %1575 = vadd.xlane.f32.xlu1 %v1562_v42 }
 0x79a   :  { %1597 = vadd.xlane.f32.xlu0 %v1585_v14 }
 0x79b   :  { %1599 = vadd.xlane.f32.xlu1 %v1586_v34 }
 0x79e   :  { %1577 = vadd.xlane.f32.xlu0 %v1563_v11 }
 0x79f   :  { %1579 = vadd.xlane.f32.xlu1 %v1564_v12 }
 0x7a2   :  { %1601 = vadd.xlane.f32.xlu0 %v1587_v50 }
 0x7a3   :  { %1603 = vadd.xlane.f32.xlu1 %v1588_v20 }
 0x7b4   :  { %1726 = vperm.xlu1 %2496, %v3113_v53  }
 0x7b8   :  { %1730 = vperm.xlu1 %2496, %v3119_v40  }
 0x7bc   :  { %1734 = vperm.xlu1 %2496, %v3126_v43  }
 0x7c0   :  { %1738 = vperm.xlu1 %2496, %v3133_v44  }
 0x7c4   :  { %2497 = vset.pattern.permute.xlu1 %v2646_v6 }
 0x813   :  { %v1568_v1 = vpop.xlane.xlu0 %1567 }
 0x814   :  { %v1566_v52 = vpop.xlane.xlu1 %1565  ;;  %v3340_v30 = vmul.f32 0.125, %v1568_v1 }
 0x815   :  { %v3342_v29 = vmul.f32 0.125, %v1566_v52 }
 0x816   :  { %v1622_v16 = vmul.f32 %v3340_v30, %v3340_v30 }
 0x817   :  { %v1621_v13 = vmul.f32 %v3342_v29, %v3342_v29  ;;  %v1590_v9 = vpop.xlane.xlu0 %1589 }
 0x818   :  { %v1613_v18 = vmul.f32 0.125, %v1590_v9  ;;  %v1592_v27 = vpop.xlane.xlu1 %1591 }
 0x819   :  { %v1614_v43 = vmul.f32 0.125, %v1592_v27 }
 0x81a   :  { %v1629_v7 = vsub.f32 %v1613_v18, %v1621_v13 }
 0x81b   :  { %v1630_v55 = vsub.f32 %v1614_v43, %v1622_v16  ;;  %v1570_v39 = vpop.xlane.xlu0 %1569 }
 0x81c   :  { %v1637_v31 = vmax.f32 %v1629_v7, 0.0  ;;  %v3348_v33 = vmul.f32 0.125, %v1570_v39  ;;  %v1572_v15 = vpop.xlane.xlu1 %1571 }
 0x81d   :  { %v1638_v23 = vmax.f32 %v1630_v55, 0.0  ;;  %v3350_v8 = vmul.f32 0.125, %v1572_v15 }
 0x81e   :  { %v1645_v3 = vadd.f32 1e-05, %v1637_v31  ;;  %v1623_v0 = vmul.f32 %v3348_v33, %v3348_v33 }
 0x81f   :  { %v1646_v32 = vadd.f32 1e-05, %v1638_v23  ;;  %v1594_v19 = vpop.xlane.xlu0 %1593  ;;  %v1624_v63 = vmul.f32 %v3350_v8, %v3350_v8 }
 0x820   :  { %2571 = vrsqrt.f32 %v1645_v3  ;;  %v1615_v26 = vmul.f32 0.125, %v1594_v19  ;;  %v1596_v2 = vpop.xlane.xlu1 %1595 }
 0x821   :  { %2573 = vrsqrt.f32 %v1646_v32  ;;  %v1616_v49 = vmul.f32 0.125, %v1596_v2 }
 0x822   :  { %v1631_v36 = vsub.f32 %v1615_v26, %v1623_v0 }
 0x823   :  { %v1632_v38 = vsub.f32 %v1616_v49, %v1624_v63  ;;  %v1574_v57 = vpop.xlane.xlu0 %1573 }
 0x824   :  { %v3356_v17 = vmul.f32 0.125, %v1574_v57  ;;  %v1576_v37 = vpop.xlane.xlu1 %1575  ;;  %v1639_v61 = vmax.f32 %v1631_v36, 0.0  ;;  %v3384_v36 = vld [vmem:[%s3517_s2 + $0x10] sm:$0xff] }
 0x825   :  { %v1640_v10 = vmax.f32 %v1632_v38, 0.0  ;;  %v3358_v41 = vmul.f32 0.125, %v1576_v37 }
 0x826   :  { %v1625_v58 = vmul.f32 %v3356_v17, %v3356_v17  ;;  %v1647_v42 = vadd.f32 1e-05, %v1639_v61 }
 0x827   :  { %v1648_v51 = vadd.f32 1e-05, %v1640_v10  ;;  %v1598_v47 = vpop.xlane.xlu0 %1597  ;;  %v1626_v24 = vmul.f32 %v3358_v41, %v3358_v41  ;;  %v3574_v10 = vld [vmem:[#allocation19_spill] sm:$0xff] }
 0x828   :  { %v1617_v35 = vmul.f32 0.125, %v1598_v47  ;;  %v1600_v4 = vpop.xlane.xlu1 %1599 }
 0x829   :  { %2575 = vrsqrt.f32 %v1648_v51  ;;  %v1618_v62 = vmul.f32 0.125, %v1600_v4  ;;  %v3400_v4 = vld [vmem:[%s3517_s2] sm:$0xff] }
 0x82a   :  { %v2572_v14 = vpop.eup %2571  ;;  %v1633_v34 = vsub.f32 %v1617_v35, %v1625_v58  ;;  %2577 = vrsqrt.f32 %v1647_v42  ;;  %v3575_v58 = vld [vmem:[#allocation20_spill] sm:$0xff] }
 0x82b   :  { %v2574_v11 = vpop.eup %2573  ;;  %v1634_v12 = vsub.f32 %v1618_v62, %v1626_v24  ;;  %v1578_v50 = vpop.xlane.xlu0 %1577  ;;  %v1661_v20 = vmul.f32 %v3113_v53, %v2572_v14 }
 0x82c   :  { %v1641_v1 = vmax.f32 %v1633_v34, 0.0  ;;  %v3365_v52 = vmul.f32 0.125, %v1578_v50  ;;  %v1580_v13 = vpop.xlane.xlu1 %1579  ;;  %v1662_v9 = vmul.f32 %v3119_v40, %v2574_v11  ;;  %v1669_v34 = vsub.f32 %v3304_v56, %v3342_v29 }
 0x82d   :  { %v1642_v18 = vmax.f32 %v1634_v12, 0.0  ;;  %v3368_v27 = vmul.f32 0.125, %v1580_v13  ;;  %1679 = vperm.xlu0 %2498, %v1661_v20   ;;  %v1670_v12 = vsub.f32 %v3302_v28, %v3340_v30  ;;  %v1672_v56 = vsub.f32 %v3312_v22, %v3350_v8 }
 0x82e   :  { %v1649_v16 = vadd.f32 1e-05, %v1641_v1  ;;  %1684 = vperm.xlu1 %2497, %v1662_v9   ;;  %v1627_v55 = vmul.f32 %v3365_v52, %v3365_v52  ;;  %v1674_v22 = vsub.f32 %v3320_v46, %v3358_v41 }
 0x82f   :  { %v1650_v43 = vadd.f32 1e-05, %v1642_v18  ;;  %v1602_v7 = vpop.xlane.xlu0 %1601  ;;  %v1628_v31 = vmul.f32 %v3368_v27, %v3368_v27 }
 0x830   :  { %2579 = vrsqrt.f32 %v1649_v16  ;;  %v1619_v53 = vmul.f32 0.125, %v1602_v7  ;;  %v1604_v39 = vpop.xlane.xlu1 %1603  ;;  %v3576_v7 = vld [vmem:[#allocation10_spill] sm:$0xff] }
 0x831   :  { %2581 = vrsqrt.f32 %v1650_v43  ;;  %v1620_v40 = vmul.f32 0.125, %v1604_v39  ;;  %2499 = vset.pattern.permute.xlu0 %v2645_v5  ;;  %v3578_v39 = vld [vmem:[#allocation11_spill] sm:$0xff] }
 0x832   :  { %v1635_v15 = vsub.f32 %v1619_v53, %v1627_v55  ;;  %2500 = vset.pattern.permute.xlu1 %v2645_v5  ;;  %1742 = vperm.xlu0 %2499, %v3192_v48   ;;  %v3577_v55 = vmax.f32 %v3576_v7, 0.0 }
 0x833   :  { %v2576_v23 = vpop.eup %2575  ;;  %v1636_v3 = vsub.f32 %v1620_v40, %v1628_v31  ;;  %1746 = vperm.xlu1 %2500, %v3200_v21   ;;  %v3579_v31 = vmax.f32 %v3578_v39, 0.0 }
 0x834   :  { %v1643_v32 = vmax.f32 %v1635_v15, 0.0  ;;  %v1664_v0 = vmul.f32 %v3133_v44, %v2576_v23  ;;  %v2578_v26 = vpop.eup %2577  ;;  %v1727_v42 = vpop.permute.xlu1 %1726 }
 0x835   :  { %v1644_v19 = vmax.f32 %v1636_v3, 0.0  ;;  %v1663_v38 = vmul.f32 %v3384_v36, %v2578_v26  ;;  %v1671_v3 = vsub.f32 %v3310_v59, %v3348_v33  ;;  %v3582_v59 = vld [vmem:[#allocation13_spill] sm:$0xff] }
 0x836   :  { %2502 = vset.pattern.permute.xlu0 %v2646_v6  ;;  %v1651_v2 = vadd.f32 1e-05, %v1643_v32  ;;  %v3583_v33 = vmax.f32 %v3582_v59, 0.0 }
 0x837   :  { %v1652_v63 = vadd.f32 1e-05, %v1644_v19  ;;  %2501 = vset.pattern.permute.xlu1 %v2646_v6  ;;  %v1673_v19 = vsub.f32 %v3318_v60, %v3356_v17 }
 0x838   :  { %1694 = vperm.xlu1 %2501, %v1664_v0   ;;  %v1731_v24 = vpop.permute.xlu1 %1730 }
 0x839   :  { %2583 = vrsqrt.f32 %v1652_v63 }
 0x83a   :  { %v2580_v49 = vpop.eup %2579  ;;  %2585 = vrsqrt.f32 %v1651_v2 }
 0x83b   :  { %v2582_v57 = vpop.eup %2581  ;;  %v1665_v44 = vmul.f32 %v3192_v48, %v2580_v49  ;;  %v1782_v48 = vld [vmem:[#allocation2 + $0x200] sm:$0xff] }
 0x83c   :  { %1689 = vperm.xlu1 %2501, %v1663_v38   ;;  %v1666_v37 = vmul.f32 %v3200_v21, %v2582_v57  ;;  %2345 = vmatprep.mubr.msk.f32.mxu0 %vm785_vm3, %v1782_v48  ;;  %v2647_v21 = vmov 12   ;;  %v1735_v62 = vpop.permute.xlu1 %1734  ;;  %v3584_v48 = vld [vmem:[#allocation14_spill] sm:$0xff] }
 0x83d   :  { %1699 = vperm.xlu0 %2502, %v1665_v44  }
 0x840   :  { %1704 = vperm.xlu1 %2501, %v1666_v37   ;;  %v1739_v14 = vpop.permute.xlu1 %1738  ;;  %v3580_v37 = vld [vmem:[#allocation12_spill] sm:$0xff] }
 0x843   :  { %v2584_v61 = vpop.eup %2583 }
 0x844   :  { %2503 = vset.pattern.permute.xlu1 %v2645_v5  ;;  %v1668_v51 = vmul.f32 %v3574_v10, %v2584_v61  ;;  %v2586_v47 = vpop.eup %2585  ;;  %v3581_v61 = vmax.f32 %v3580_v37, 0.0  ;;  %v2648_v37 = vmov 13  }
 0x845   :  { %1750 = vperm.xlu1 %2503, %v3575_v58   ;;  %v1667_v35 = vmul.f32 %v3575_v58, %v2586_v47 }
 0x846   :  { %1714 = vperm.xlu0 %2502, %v1668_v51  }
 0x849   :  { %2504 = vset.pattern.permute.xlu1 %v2646_v6  ;;  %v3406_v6 = vld [vmem:[%s3517_s2 + $0x8] sm:$0xff] }
 0x84a   :  { %1709 = vperm.xlu1 %2504, %v1667_v35   ;;  %2506 = vset.pattern.permute.xlu0 %v2647_v21 }
 0x84b   :  { %1787 = vperm.xlu0 %2506, %v3400_v4  }
 0x84e   :  { %2505 = vset.pattern.permute.xlu1 %v2645_v5  ;;  %v3412_v5 = vld [vmem:[%s3517_s2 + $0x18] sm:$0xff] }
 0x84f   :  { %1754 = vperm.xlu1 %2505, %v3574_v10   ;;  %1799 = vperm.xlu0 %2506, %v3412_v5  }
 0x853   :  { %2507 = vset.pattern.permute.xlu1 %v2647_v21  ;;  %v3585_v21 = vmax.f32 %v3584_v48, 0.0  ;;  %2508 = vset.pattern.permute.xlu0 %v2648_v37 }
 0x854   :  { %1791 = vperm.xlu1 %2507, %v3406_v6  }
 0x858   :  { %1795 = vperm.xlu1 %2507, %v3384_v36  }
 0x85c   :  { %2509 = vset.pattern.permute.xlu1 %v2648_v37 }
 0x8ac   :  { %v1680_v11 = vpop.permute.xlu0 %1679 }
 0x8ad   :  { %v1717_v50 = vmul.f32 %v1680_v11, %v1669_v34  ;;  %v1685_v20 = vpop.permute.xlu1 %1684 }
 0x8ae   :  { %v1718_v1 = vmul.f32 %v1685_v20, %v1670_v12 }
 0x8af   :  { %v1757_v13 = vadd.f32 %v1727_v42, %v1717_v50  ;;  %v1676_v50 = vsub.f32 %v3328_v54, %v3368_v27  ;;  %v1785_v54 = vld [vmem:[#allocation2 + $0x218] sm:$0xff] }
 0x8b0   :  { %v1758_v9 = vadd.f32 %v1731_v24, %v1718_v1  ;;  %v3586_v24 = vld [vmem:[#allocation15_spill] sm:$0xff] }
 0x8b1   :  { %v1765_v18 = vmax.f32 %v1757_v13, 0.0  ;;  %v1743_v15 = vpop.permute.xlu0 %1742  ;;  %v3587_v46 = vmax.f32 %v3586_v24, 0.0 }
 0x8b2   :  { %v1766_v16 = vmax.f32 %v1758_v9, 0.0  ;;  %v1747_v43 = vpop.permute.xlu1 %1746 }
 0x8b3   :  { %v1773_v53 = vadd.f32 %v1765_v18, %v3577_v55 }
 0x8b4   :  { %v1774_v40 = vadd.f32 %v1766_v16, %v3579_v31  ;;  %v1783_v31 = vld [vmem:[#allocation2 + $0x208] sm:$0xff] }
 0x8b6   :  { %v2422_v29 = vpack.c.bf16 %v1774_v40, %v1773_v53  ;;  %v3590_v53 = vld [vmem:[#allocation17_spill] sm:$0xff]  ;;  %v1784_v40 = vld [vmem:[#allocation2 + $0x210] sm:$0xff] }
 0x8b7   :  { %v1695_v28 = vpop.permute.xlu1 %1694 }
 0x8b8   :  { %v1720_v30 = vmul.f32 %v1695_v28, %v1672_v56  ;;  %2423 = vmatprep.subr.bf16.mxu0 %v2422_v29 }
 0x8b9   :  { %2425 = vmatpush3.bf16.msra.mxu0 %v2422_v29 }
 0x8ba   :  { %v1760_v23 = vadd.f32 %v1739_v14, %v1720_v30 }
 0x8bb   :  { %v1690_v32 = vpop.permute.xlu1 %1689 }
 0x8bc   :  { %v1719_v0 = vmul.f32 %v1690_v32, %v1671_v3  ;;  %v1700_v26 = vpop.permute.xlu0 %1699  ;;  %v1768_v63 = vmax.f32 %v1760_v23, 0.0 }
 0x8bd   :  { %v1721_v2 = vmul.f32 %v1700_v26, %v1673_v19 }
 0x8be   :  { %v1759_v49 = vadd.f32 %v1735_v62, %v1719_v0  ;;  %v1776_v10 = vadd.f32 %v1768_v63, %v3581_v61  ;;  %v1675_v62 = vsub.f32 %v3326_v25, %v3365_v52  ;;  %v3591_v25 = vmax.f32 %v3590_v53, 0.0 }
 0x8bf   :  { %v1761_v8 = vadd.f32 %v1743_v15, %v1721_v2  ;;  %v1705_v38 = vpop.permute.xlu1 %1704 }
 0x8c0   :  { %v1767_v57 = vmax.f32 %v1759_v49, 0.0  ;;  %v1722_v44 = vmul.f32 %v1705_v38, %v1674_v22 }
 0x8c1   :  { %v1769_v47 = vmax.f32 %v1761_v8, 0.0 }
 0x8c2   :  { %v1775_v51 = vadd.f32 %v1767_v57, %v3583_v33  ;;  %v1762_v60 = vadd.f32 %v1747_v43, %v1722_v44  ;;  %v3588_v43 = vld [vmem:[#allocation16_spill] sm:$0xff] }
 0x8c3   :  { %v1777_v42 = vadd.f32 %v1769_v47, %v3585_v21  ;;  %v3589_v7 = vmax.f32 %v3588_v43, 0.0 }
 0x8c4   :  { %v1770_v17 = vmax.f32 %v1762_v60, 0.0  ;;  %v1751_v58 = vpop.permute.xlu1 %1750  ;;  %v2426_v35 = vpack.c.bf16 %v1776_v10, %v1775_v51 }
 0x8c5   :  { %v1715_v11 = vpop.permute.xlu0 %1714 }
 0x8c6   :  { %v1778_v41 = vadd.f32 %v1770_v17, %v3587_v46  ;;  %2427 = vmatprep.subr.bf16.mxu0 %v2426_v35  ;;  %v1724_v1 = vmul.f32 %v1715_v11, %v1676_v50 }
 0x8c7   :  { %2429 = vmatpush3.bf16.msra.mxu0 %v2426_v35 }
 0x8c8   :  { %v2430_v14 = vpack.c.bf16 %v1778_v41, %v1777_v42 }
 0x8c9   :  { %v1710_v34 = vpop.permute.xlu1 %1709 }
 0x8ca   :  { %v1723_v12 = vmul.f32 %v1710_v34, %v1675_v62  ;;  %2431 = vmatprep.subr.bf16.mxu0 %v2430_v14  ;;  %v1788_v29 = vpop.permute.xlu0 %1787 }
 0x8cb   :  { %2433 = vmatpush3.bf16.msra.mxu0 %v2430_v14 }
 0x8cc   :  { %v1763_v20 = vadd.f32 %v1751_v58, %v1723_v12 }
 0x8ce   :  { %v1755_v13 = vpop.permute.xlu1 %1754  ;;  %v1771_v9 = vmax.f32 %v1763_v20, 0.0  ;;  %v1800_v2 = vpop.permute.xlu0 %1799 }
 0x8cf   :  { %v1764_v18 = vadd.f32 %v1755_v13, %v1724_v1 }
 0x8d0   :  { %v1779_v55 = vadd.f32 %v1771_v9, %v3589_v7 }
 0x8d1   :  { %v1772_v16 = vmax.f32 %v1764_v18, 0.0 }
 0x8d3   :  { %v1780_v52 = vadd.f32 %v1772_v16, %v3591_v25  ;;  %v1792_v27 = vpop.permute.xlu1 %1791 }
 0x8d5   :  { %v2434_v39 = vpack.c.bf16 %v1780_v52, %v1779_v55 }
 0x8d7   :  { %2435 = vmatprep.subr.bf16.mxu0 %v2434_v39  ;;  %v1796_v0 = vpop.permute.xlu1 %1795 }
 0x8d8   :  { %2437 = vmatpush3.bf16.msra.mxu0 %v2434_v39 }
 0x8db   :  { %2346 = vmatmul.mubr.msk.f32.vlgmr.msra.gmra.mrb[20].mxu0 %vm785_vm3, %v1783_v31  ;;  %v2649_v31 = vmov 14  }
 0x8dc   :  { %2348 = vmatprep.mubr.msk.f32.mxu0 %vm785_vm3, %v1784_v40 }
 0x8df   :  { %2349 = vmatmul.mubr.msk.f32.gmra.mrb[22].mxu0 %vm785_vm3, %v1785_v54 }
 0x9ae   :  { %v2347_v56 = vpop.f32.mrb[20].mxu0 }
 0x9af   :  { %v3451_v15 = vadd.f32 %v2347_v56, %v1792_v27  ;;  %v1880_v28 = vpop.f32.mrb[21].mxu0  ;;  %v2650_v27 = vmov 0.0|0.0  }
 0x9b0   :  { %v3453_v30 = vadd.f32 %v1880_v28, %v1788_v29  ;;  %2438 = vmatprep.subr.bf16.mxu1 %v2650_v27  ;;  %v2652_v28 = vmov 15  }
 0x9b1   :  { %v1900_v23 = vmul.f32 %v3573_v45, %v3451_v15 }
 0x9b2   :  { %v1899_v3 = vmul.f32 %v3573_v45, %v3453_v30  ;;  %v2350_v32 = vpop.f32.mrb[22].mxu0 }
 0x9b3   :  { %1905 = vadd.xlane.f32.xlu0 %v1900_v23  ;;  %v1890_v19 = vpop.f32.mrb[23].mxu0  ;;  %v3461_v49 = vadd.f32 %v2350_v32, %v1800_v2  ;;  %v1912_v22 = vmul.f32 %v1900_v23, %v1900_v23 }
 0x9b4   :  { %1903 = vadd.xlane.f32.xlu1 %v1899_v3  ;;  %v1911_v26 = vmul.f32 %v1899_v3, %v1899_v3  ;;  %v3459_v63 = vadd.f32 %v1890_v19, %v1796_v0 }
 0x9b5   :  { %v1902_v38 = vmul.f32 %v3573_v45, %v3461_v49 }
 0x9b6   :  { %v1901_v8 = vmul.f32 %v3573_v45, %v3459_v63 }
 0x9b7   :  { %1915 = vadd.xlane.f32.xlu0 %v1911_v26  ;;  %v1914_v44 = vmul.f32 %v1902_v38, %v1902_v38 }
 0x9b8   :  { %1917 = vadd.xlane.f32.xlu1 %v1912_v22  ;;  %v1913_v57 = vmul.f32 %v1901_v8, %v1901_v8 }
 0x9bb   :  { %1907 = vadd.xlane.f32.xlu0 %v1901_v8 }
 0x9bc   :  { %1909 = vadd.xlane.f32.xlu1 %v1902_v38 }
 0x9bf   :  { %1919 = vadd.xlane.f32.xlu0 %v1913_v57 }
 0x9c0   :  { %1921 = vadd.xlane.f32.xlu1 %v1914_v44  ;;  %v3593_v44 = vld [vmem:[#allocation7_spill] sm:$0xff] }
 0xa40   :  { %v1906_v61 = vpop.xlane.xlu0 %1905 }
 0xa41   :  { %v1904_v10 = vpop.xlane.xlu1 %1903  ;;  %v3467_v59 = vmul.f32 0.125, %v1906_v61 }
 0xa42   :  { %v3469_v33 = vmul.f32 0.125, %v1904_v10  ;;  %v3595_v10 = vld [vmem:[#allocation6_spill] sm:$0xff] }
 0xa43   :  { %v1932_v17 = vmul.f32 %v3467_v59, %v3467_v59 }
 0xa44   :  { %v1931_v51 = vmul.f32 %v3469_v33, %v3469_v33  ;;  %v1916_v47 = vpop.xlane.xlu0 %1915 }
 0xa45   :  { %v1927_v45 = vmul.f32 0.125, %v1916_v47  ;;  %v1918_v60 = vpop.xlane.xlu1 %1917 }
 0xa46   :  { %v1928_v58 = vmul.f32 0.125, %v1918_v60 }
 0xa47   :  { %v1935_v35 = vsub.f32 %v1927_v45, %v1931_v51  ;;  %v3596_v51 = vmax.f32 %v3595_v10, 0.0 }
 0xa48   :  { %v1936_v48 = vsub.f32 %v1928_v58, %v1932_v17  ;;  %v1908_v42 = vpop.xlane.xlu0 %1907 }
 0xa49   :  { %v1939_v21 = vmax.f32 %v1935_v35, 0.0  ;;  %v1910_v24 = vpop.xlane.xlu1 %1909  ;;  %v3477_v50 = vmul.f32 0.125, %v1908_v42 }
 0xa4a   :  { %v1940_v46 = vmax.f32 %v1936_v48, 0.0  ;;  %v3475_v14 = vmul.f32 0.125, %v1910_v24  ;;  %v3597_v24 = vld [vmem:[#allocation8_spill] sm:$0xff] }
 0xa4b   :  { %v1943_v41 = vadd.f32 1e-05, %v1939_v21  ;;  %v1933_v9 = vmul.f32 %v3477_v50, %v3477_v50 }
 0xa4c   :  { %v1944_v62 = vadd.f32 1e-05, %v1940_v46  ;;  %v1920_v12 = vpop.xlane.xlu0 %1919  ;;  %v1934_v20 = vmul.f32 %v3475_v14, %v3475_v14  ;;  %v1958_v60 = vsub.f32 %v3461_v49, %v3475_v14  ;;  %v3598_v46 = vmax.f32 %v3597_v24, 0.0 }
 0xa4d   :  { %2587 = vrsqrt.f32 %v1943_v41  ;;  %v1922_v34 = vpop.xlane.xlu1 %1921  ;;  %v1929_v1 = vmul.f32 0.125, %v1920_v12 }
 0xa4e   :  { %2589 = vrsqrt.f32 %v1944_v62  ;;  %v1930_v11 = vmul.f32 0.125, %v1922_v34  ;;  %v3599_v62 = vld [vmem:[#allocation9_spill] sm:$0xff] }
 0xa4f   :  { %v1937_v18 = vsub.f32 %v1929_v1, %v1933_v9  ;;  %v3600_v34 = vmax.f32 %v3599_v62, 0.0 }
 0xa50   :  { %v1938_v13 = vsub.f32 %v1930_v11, %v1934_v20 }
 0xa51   :  { %v1941_v25 = vmax.f32 %v1937_v18, 0.0 }
 0xa52   :  { %v1942_v16 = vmax.f32 %v1938_v13, 0.0 }
 0xa53   :  { %v1945_v39 = vadd.f32 1e-05, %v1941_v25 }
 0xa54   :  { %v1946_v52 = vadd.f32 1e-05, %v1942_v16 }
 0xa56   :  { %2591 = vrsqrt.f32 %v1946_v52 }
 0xa57   :  { %v2588_v43 = vpop.eup %2587  ;;  %2593 = vrsqrt.f32 %v1945_v39 }
 0xa58   :  { %v2590_v7 = vpop.eup %2589  ;;  %v1951_v55 = vmul.f32 %v3400_v4, %v2588_v43 }
 0xa59   :  { %v1952_v53 = vmul.f32 %v3406_v6, %v2590_v7 }
 0xa5a   :  { %1961 = vperm.xlu0 %2508, %v1951_v55  }
 0xa5b   :  { %1966 = vperm.xlu1 %2509, %v1952_v53  }
 0xa5e   :  { %2514 = vset.pattern.permute.xlu0 %v2652_v28 }
 0xa5f   :  { %2510 = vset.pattern.permute.xlu1 %v2649_v31 }
 0xa60   :  { %1984 = vperm.xlu1 %2510, %v3400_v4   ;;  %v2592_v40 = vpop.eup %2591  ;;  %v3592_v4 = vmov 0.0  }
 0xa61   :  { %v1954_v54 = vmul.f32 %v3412_v5, %v2592_v40  ;;  %v2594_v56 = vpop.eup %2593  ;;  %2359 = vmatprep.mubr.msk.f32.mxu1 %vm2651_vm4, %v3592_v4 }
 0xa62   :  { %v1953_v29 = vmul.f32 %v3384_v36, %v2594_v56 }
 0xa64   :  { %1988 = vperm.xlu1 %2510, %v3406_v6   ;;  %v2013_v6 = vld [vmem:[%s3517_s2] sm:$0xff] }
 0xa68   :  { %1992 = vperm.xlu1 %2510, %v3384_v36   ;;  %v1955_v36 = vsub.f32 %v3453_v30, %v3469_v33 }
 0xa6c   :  { %2511 = vset.pattern.permute.xlu1 %v2648_v37  ;;  %v3594_v37 = vmax.f32 %v3593_v44, 0.0 }
 0xa6d   :  { %1976 = vperm.xlu1 %2511, %v1954_v54  }
 0xa71   :  { %1971 = vperm.xlu1 %2511, %v1953_v29  }
 0xa75   :  { %2512 = vset.pattern.permute.xlu1 %v2649_v31 }
 0xa76   :  { %1996 = vperm.xlu1 %2512, %v3412_v5   ;;  %v1956_v5 = vsub.f32 %v3451_v15, %v3467_v59  ;;  %v1957_v15 = vsub.f32 %v3459_v63, %v3477_v50  ;;  %v2012_v63 = vld [vmem:[#allocation2 + $0x280] sm:$0xff] }
 0xa7a   :  { %2513 = vset.pattern.permute.xlu1 %v2652_v28 }
 0xa7b   :  { %2016 = vperm.xlu1 %2513, %v2013_v6  }
 0xad9   :  { %v1962_v3 = vpop.permute.xlu0 %1961 }
 0xada   :  { %v1967_v23 = vpop.permute.xlu1 %1966  ;;  %v1979_v32 = vmul.f32 %v1962_v3, %v1955_v36 }
 0xadb   :  { %v1980_v26 = vmul.f32 %v1967_v23, %v1956_v5 }
 0xadf   :  { %v1985_v19 = vpop.permute.xlu1 %1984 }
 0xae0   :  { %v1999_v0 = vadd.f32 %v1985_v19, %v1979_v32 }
 0xae2   :  { %v2003_v22 = vmax.f32 %v1999_v0, 0.0 }
 0xae3   :  { %v1989_v2 = vpop.permute.xlu1 %1988 }
 0xae4   :  { %v2000_v8 = vadd.f32 %v1989_v2, %v1980_v26  ;;  %v2007_v61 = vadd.f32 %v2003_v22, %v3594_v37 }
 0xae6   :  { %v2004_v38 = vmax.f32 %v2000_v8, 0.0 }
 0xae7   :  { %v1993_v57 = vpop.permute.xlu1 %1992 }
 0xae8   :  { %v2008_v47 = vadd.f32 %v2004_v38, %v3596_v51 }
 0xaea   :  { %v2439_v45 = vpack.c.bf16 %v2008_v47, %v2007_v61 }
 0xaec   :  { %v1977_v30 = vpop.permute.xlu1 %1976  ;;  %2440 = vmatpush3.bf16.msra.mxu1 %v2439_v45 }
 0xaed   :  { %2441 = vmatprep.subr.bf16.mxu1 %v2650_v27  ;;  %v1982_v58 = vmul.f32 %v1977_v30, %v1958_v60 }
 0xaf0   :  { %v1972_v59 = vpop.permute.xlu1 %1971 }
 0xaf1   :  { %v1981_v33 = vmul.f32 %v1972_v59, %v1957_v15 }
 0xaf3   :  { %v2001_v17 = vadd.f32 %v1993_v57, %v1981_v33 }
 0xaf5   :  { %v1997_v35 = vpop.permute.xlu1 %1996  ;;  %v2005_v48 = vmax.f32 %v2001_v17, 0.0 }
 0xaf6   :  { %v2002_v21 = vadd.f32 %v1997_v35, %v1982_v58 }
 0xaf7   :  { %v2009_v41 = vadd.f32 %v2005_v48, %v3598_v46 }
 0xaf8   :  { %v2006_v42 = vmax.f32 %v2002_v21, 0.0 }
 0xafa   :  { %v2010_v11 = vadd.f32 %v2006_v42, %v3600_v34  ;;  %v2017_v50 = vpop.permute.xlu1 %2016 }
 0xafc   :  { %v2442_v12 = vpack.c.bf16 %v2010_v11, %v2009_v41 }
 0xafe   :  { %2443 = vmatpush3.bf16.msra.mxu1 %v2442_v12 }
 0xb01   :  { %2360 = vmatmul.mubr.msk.f32.vlgmr.msra.gmra.mrb[16].mxu1 %vm326_vm2, %v2012_v63 }
 0xbd4   :  { %v2088_v20 = vpop.f32.mrb[16].mxu1 }
 0xbd5   :  { %v2089_v49 = vadd.f32 %v2088_v20, %v2017_v50  ;;  %v2361_v14 = vpop.f32.mrb[17].mxu1 }
 0xbd7   :  { %2092 = vst [vmem:[%s3518_s3] sm:$0xff] %v2089_v49 }
 0xbd8   :  { %2097 = vsyncpa [#allocation3], 1 }

</bundles_post_ra>
